<compile_context>
chip_gen: v7x
topology: tpu7x:2x2x1
jax: 0.10.0
libtpu: 0.0.40
codegen_flags: <defaults>
</compile_context>

<pallas_src>
import functools

import jax
import jax.numpy as jnp
import numpy as np
from jax.experimental import pallas as pl
from jax.experimental.pallas import tpu as pltpu

EPS = 1e-5


def _round_up(a, b):
    return (a + b - 1) // b * b


def _shift_rows(x, k):
    """result[p] = x[(p + k) % M] for a static int k (circular row shift).

    Implemented with static slices + concat (unambiguous semantics); candidate for
    pltpu.roll(x, -k % M, axis=0) to move the shift onto the XLU rotate unit.
    """
    m = x.shape[0]
    k = k % m
    if k == 0:
        return x
    return jnp.concatenate([x[k:], x[:k]], axis=0)


# ---------------------------------------------------------------------------
# In-kernel helpers
# ---------------------------------------------------------------------------
def _bn_scale_bias(x_masked, gamma, beta, g, gt, count):
    # x_masked: (M, L) f32 with invalid (junk) rows already zeroed.
    # Single-pass training-mode BN: per-channel sum / sum-of-squares, folded with the
    # affine gamma/beta into a per-lane scale & bias.
    s1 = jnp.sum(x_masked, axis=0, keepdims=True)                         # (1, L)
    s2 = jnp.sum(x_masked * x_masked, axis=0, keepdims=True)              # (1, L)
    mean = jnp.dot(s1, g, preferred_element_type=jnp.float32) / count     # (1, C)
    ex2 = jnp.dot(s2, g, preferred_element_type=jnp.float32) / count      # (1, C)
    var = ex2 - mean * mean
    inv = jax.lax.rsqrt(var + EPS)
    scale_c = gamma * inv                                                 # (1, C)
    bias_c = beta - mean * scale_c                                        # (1, C)
    scale_l = jnp.dot(scale_c, gt, preferred_element_type=jnp.float32)    # (1, L)
    bias_l = jnp.dot(bias_c, gt, preferred_element_type=jnp.float32)      # (1, L)
    return scale_l, bias_l


# ---------------------------------------------------------------------------
# Pallas kernel: full basic block, two MXU matmuls total
# ---------------------------------------------------------------------------
def basic_block_kernel(xrow_ref, w1_ref, w2_ref, g_ref, gt_ref, rmask_ref,
                       g1_ref, b1_ref, g2_ref, b2_ref, *rest,
                       lout, count, has_shortcut):
    if has_shortcut:
        gs_ref, bs_ref, out_ref = rest
    else:
        (out_ref,) = rest

    g = g_ref[...]
    gt = gt_ref[...]
    rmask = rmask_ref[...]            # (M, 1) f32, 1.0 on valid output rows

    # ---- conv1 (3 row taps) + 1x1 shortcut: ONE bf16 MXU matmul ----------------
    big1 = jnp.dot(xrow_ref[...], w1_ref[...],
                   preferred_element_type=jnp.float32)            # (M, 4*L) f32
    y1c = (big1[:, 0 * lout:1 * lout]
           + _shift_rows(big1[:, 1 * lout:2 * lout], 1)
           + _shift_rows(big1[:, 2 * lout:3 * lout], 2))
    sc = _shift_rows(big1[:, 3 * lout:4 * lout], 1)               # shortcut, pre-BN

    # ---- bn1 + relu -------------------------------------------------------------
    y1m = y1c * rmask                                             # zero junk rows
    sc1, bi1 = _bn_scale_bias(y1m, g1_ref[...], b1_ref[...], g, gt, count)
    # re-zero junk rows: they are conv2's implicit zero row-padding
    y1 = jnp.maximum(y1m * sc1 + bi1, 0.0) * rmask

    # ---- conv2 (3 row taps): ONE bf16 MXU matmul ---------------------------------
    big2 = jnp.dot(y1.astype(jnp.bfloat16), w2_ref[...],
                   preferred_element_type=jnp.float32)            # (M, 3*L) f32
    y2c = (_shift_rows(big2[:, 0 * lout:1 * lout], -1)
           + big2[:, 1 * lout:2 * lout]
           + _shift_rows(big2[:, 2 * lout:3 * lout], 1))

    # ---- bn2 ---------------------------------------------------------------------
    y2m = y2c * rmask
    sc2, bi2 = _bn_scale_bias(y2m, g2_ref[...], b2_ref[...], g, gt, count)
    y2 = y2m * sc2 + bi2

    # ---- shortcut: BN on the 1x1 conv, or plain identity lane remap ---------------
    if has_shortcut:
        scs, bis = _bn_scale_bias(sc, gs_ref[...], bs_ref[...], g, gt, count)
        sc = sc * scs + bis

    # ---- residual add + relu, lane-dense store ------------------------------------
    out_ref[...] = jnp.maximum(y2 + sc, 0.0)


# ---------------------------------------------------------------------------
# Wrapper: layout packing + banded-weight construction (glue, not the hot path)
# ---------------------------------------------------------------------------
def basic_block_forward(x_nchw, params, *, stride=1):
    # TODO(synk): stride > 1 conv1/shortcut path (strided row/lane selection) not implemented.
    assert stride == 1, "only stride=1 is implemented in the Pallas kernel"

    N, Cin, H, W = x_nchw.shape
    w1 = params["w1"]                      # (C, Cin, 3, 3) torch OIHW
    w2 = params["w2"]                      # (C, C, 3, 3)
    C = w1.shape[0]
    has_shortcut = (stride != 1) or (Cin != C)

    Wp = W + 2                             # zero-padded width
    Hp = _round_up(H + 2, 8)               # zero-padded + sublane-aligned rows/image
    M = N * Hp
    Lin = _round_up(Wp * Cin, 128)         # input row length (lanes)
    Lout = _round_up(W * C, 128)           # output row length (lanes)

    # --- activations: NCHW -> lane-packed zero-padded row frames (M, Lin), bf16 ---
    x_nhwc = jnp.transpose(x_nchw, (0, 2, 3, 1))
    xpad = jnp.pad(x_nhwc, ((0, 0), (1, Hp - H - 1), (1, 1), (0, 0)))  # (N,Hp,Wp,Cin)
    xrow = jnp.pad(xpad.reshape(N, Hp, Wp * Cin),
                   ((0, 0), (0, 0), (0, Lin - Wp * Cin)))
    xrow = xrow.reshape(M, Lin).astype(jnp.bfloat16)

    # --- fold the kw (column) taps into banded weight matrices ---------------------
    # conv1 reads padded columns:   lane (w+kw)*Cin+ci   -> lane w*C+co
    S1 = np.zeros((3, Wp, W), np.float32)
    # conv2 reads y1's columns:     lane (w+kw-1)*C+ci   -> lane w*C+co
    S2 = np.zeros((3, W, W), np.float32)
    # 1x1 shortcut:                 lane (w+1)*Cin+ci    -> lane w*C+co
    Ssc = np.zeros((Wp, W), np.float32)
    for w in range(W):
        Ssc[w + 1, w] = 1.0
        for kw in range(3):
            S1[kw, w + kw, w] = 1.0
            wi = w + kw - 1
            if 0 <= wi < W:
                S2[kw, wi, w] = 1.0

    Wt1 = jnp.transpose(w1, (2, 3, 1, 0))              # (kh, kw, Cin, C)
    Wt2 = jnp.transpose(w2, (2, 3, 1, 0))              # (kh, kw, C, C)
    core1 = jnp.einsum('kxw,hkio->hxiwo', S1, Wt1).reshape(3, Wp * Cin, W * C)
    core2 = jnp.einsum('kxw,hkio->hxiwo', S2, Wt2).reshape(3, W * C, W * C)
    if has_shortcut:
        Wsc = jnp.transpose(params["ws"][:, :, 0, 0], (1, 0))      # (Cin, C)
    else:
        Wsc = jnp.eye(Cin, dtype=jnp.float32)                      # identity remap
    coresc = jnp.einsum('xw,io->xiwo', Ssc, Wsc).reshape(Wp * Cin, W * C)

    core1 = jnp.pad(core1, ((0, 0), (0, Lin - Wp * Cin), (0, Lout - W * C)))
    coresc = jnp.pad(coresc, ((0, Lin - Wp * Cin), (0, Lout - W * C)))
    core2 = jnp.pad(core2, ((0, 0), (0, Lout - W * C), (0, Lout - W * C)))

    # K-packed, lane-padded bf16 MXU weights:
    #   wall1: conv1 taps kh=0,1,2 and the shortcut as 4 lane blocks of one matmul
    #   wall2: conv2 taps kh=0,1,2 as 3 lane blocks of one matmul
    wall1 = jnp.concatenate([core1[0], core1[1], core1[2], coresc],
                            axis=1).astype(jnp.bfloat16)            # (Lin, 4*Lout)
    wall2 = jnp.concatenate([core2[0], core2[1], core2[2]],
                            axis=1).astype(jnp.bfloat16)            # (Lout, 3*Lout)

    # --- constant gather matrices for per-channel BN statistics --------------------
    G = np.zeros((Lout, C), np.float32)                # lane (w*C+c) -> channel c
    for w in range(W):
        G[w * C:(w + 1) * C, :] = np.eye(C, dtype=np.float32)
    Gt = np.ascontiguousarray(G.T)                     # channel c -> its lanes

    # row-validity mask (1.0 on rows holding a real output row of some image)
    rmask = (np.arange(M) % Hp < H).astype(np.float32).reshape(M, 1)

    g1 = params["g1"].reshape(1, C).astype(jnp.float32)
    b1 = params["b1"].reshape(1, C).astype(jnp.float32)
    g2 = params["g2"].reshape(1, C).astype(jnp.float32)
    b2 = params["b2"].reshape(1, C).astype(jnp.float32)

    inputs = [xrow, wall1, wall2, jnp.asarray(G), jnp.asarray(Gt),
              jnp.asarray(rmask), g1, b1, g2, b2]
    if has_shortcut:
        inputs += [params["gs"].reshape(1, C).astype(jnp.float32),
                   params["bs"].reshape(1, C).astype(jnp.float32)]

    kern = functools.partial(basic_block_kernel, lout=Lout,
                             count=float(N * H * W), has_shortcut=has_shortcut)
    vmem = pl.BlockSpec(memory_space=pltpu.MemorySpace.VMEM)

    # Single program (no grid): PyTorch training-mode BN couples the whole batch and
    # these shapes fit VMEM comfortably on all generations.
    # TODO(synk): for real ResNet-sized inputs, tile over (batch, row blocks) with a
    # "parallel" grid axis (v7x megacore) and accumulate cross-tile BN sum/sumsq.
    out2d = pl.pallas_call(
        kern,
        out_shape=jax.ShapeDtypeStruct((M, Lout), jnp.float32),
        in_specs=[vmem] * len(inputs),
        out_specs=vmem,
        compiler_params=pltpu.CompilerParams(vmem_limit_bytes=32 * 1024 * 1024),
    )(*inputs)

    out = out2d.reshape(N, Hp, Lout)[:, :H, :W * C].reshape(N, H, W, C)
    return jnp.transpose(out, (0, 3, 1, 2))            # back to NCHW


# ---------------------------------------------------------------------------
# Pure-JAX reference (mirrors the PyTorch forward, f32) for correctness checking
# ---------------------------------------------------------------------------
def _bn_ref(x_nchw, gamma, beta):
    mean = jnp.mean(x_nchw, axis=(0, 2, 3), keepdims=True)
    var = jnp.mean((x_nchw - mean) ** 2, axis=(0, 2, 3), keepdims=True)
    g = gamma.reshape(1, -1, 1, 1)
    b = beta.reshape(1, -1, 1, 1)
    return (x_nchw - mean) * jax.lax.rsqrt(var + EPS) * g + b


def reference_forward(x_nchw, params, *, stride=1):
    dn = ("NCHW", "OIHW", "NCHW")
    conv = lambda x, w, s, p: jax.lax.conv_general_dilated(
        x, w, window_strides=(s, s), padding=p, dimension_numbers=dn)
    out = jax.nn.relu(_bn_ref(conv(x_nchw, params["w1"], stride, "SAME"),
                              params["g1"], params["b1"]))
    out = _bn_ref(conv(out, params["w2"], 1, "SAME"), params["g2"], params["b2"])
    Cin, C = x_nchw.shape[1], params["w1"].shape[0]
    if stride != 1 or Cin != C:
        sc = _bn_ref(conv(x_nchw, params["ws"], stride, "VALID"),
                     params["gs"], params["bs"])
    else:
        sc = x_nchw
    return jax.nn.relu(out + sc)


# ---------------------------------------------------------------------------
if __name__ == "__main__":
    # Small shapes: batch=2, in_planes=4, planes=8, spatial=16x16, stride=1
    N, Cin, C, H, W = 2, 4, 8, 16, 16
    key = jax.random.PRNGKey(0)
    k = jax.random.split(key, 8)

    x = jax.random.normal(k[0], (N, Cin, H, W), jnp.float32)
    params = {
        "w1": 0.1 * jax.random.normal(k[1], (C, Cin, 3, 3), jnp.float32),
        "w2": 0.1 * jax.random.normal(k[2], (C, C, 3, 3), jnp.float32),
        "ws": 0.1 * jax.random.normal(k[3], (C, Cin, 1, 1), jnp.float32),
        "g1": 1.0 + 0.1 * jax.random.normal(k[4], (C,), jnp.float32),
        "b1": 0.1 * jax.random.normal(k[5], (C,), jnp.float32),
        "g2": 1.0 + 0.1 * jax.random.normal(k[6], (C,), jnp.float32),
        "b2": 0.1 * jax.random.normal(k[7], (C,), jnp.float32),
        "gs": jnp.ones((C,), jnp.float32),
        "bs": jnp.zeros((C,), jnp.float32),
    }

    out = jax.block_until_ready(basic_block_forward(x, params, stride=1))
    ref = jax.block_until_ready(reference_forward(x, params, stride=1))

    assert out.shape == (N, C, H, W), out.shape
    # Kernel feeds the MXU bf16 operands (f32 accumulation / f32 BN math), so compare
    # against the pure-f32 reference with a correspondingly looser tolerance.
    np.testing.assert_allclose(np.asarray(out), np.asarray(ref),
                               rtol=5e-2, atol=5e-2)
    print("KERNEL_OK")
</pallas_src>

<mosaic_0001>
module attributes {stable_mosaic.version = 11 : i64} {
  func.func @basic_block_kernel(%arg0: memref<48x128xbf16, #tpu.memory_space<vmem>>, %arg1: memref<128x512xbf16, #tpu.memory_space<vmem>>, %arg2: memref<128x384xbf16, #tpu.memory_space<vmem>>, %arg3: memref<128x8xf32, #tpu.memory_space<vmem>>, %arg4: memref<8x128xf32, #tpu.memory_space<vmem>>, %arg5: memref<48x1xf32, #tpu.memory_space<vmem>>, %arg6: memref<1x8xf32, #tpu.memory_space<vmem>>, %arg7: memref<1x8xf32, #tpu.memory_space<vmem>>, %arg8: memref<1x8xf32, #tpu.memory_space<vmem>>, %arg9: memref<1x8xf32, #tpu.memory_space<vmem>>, %arg10: memref<1x8xf32, #tpu.memory_space<vmem>>, %arg11: memref<1x8xf32, #tpu.memory_space<vmem>>, %arg12: memref<48x128xf32, #tpu.memory_space<vmem>>) attributes {dimension_semantics = [], scalar_prefetch = 0 : i64, scratch_operands = 0 : i64, tpu.core_type = #tpu.core_type<tc>} {
    %c0 = arith.constant 0 : index
    %c0_0 = arith.constant 0 : index
    %0 = vector.load %arg3[%c0, %c0_0] : memref<128x8xf32, #tpu.memory_space<vmem>>, vector<128x8xf32>
    %c0_1 = arith.constant 0 : index
    %c0_2 = arith.constant 0 : index
    %1 = vector.load %arg4[%c0_1, %c0_2] : memref<8x128xf32, #tpu.memory_space<vmem>>, vector<8x128xf32>
    %c0_3 = arith.constant 0 : index
    %c0_4 = arith.constant 0 : index
    %2 = vector.load %arg5[%c0_3, %c0_4] : memref<48x1xf32, #tpu.memory_space<vmem>>, vector<48x1xf32>
    %c0_5 = arith.constant 0 : index
    %c0_6 = arith.constant 0 : index
    %3 = vector.load %arg0[%c0_5, %c0_6] : memref<48x128xbf16, #tpu.memory_space<vmem>>, vector<48x128xbf16>
    %c0_7 = arith.constant 0 : index
    %c0_8 = arith.constant 0 : index
    %4 = vector.load %arg1[%c0_7, %c0_8] : memref<128x512xbf16, #tpu.memory_space<vmem>>, vector<128x512xbf16>
    %cst = arith.constant dense<0.000000e+00> : vector<48x512xf32>
    %5 = tpu.matmul %3, %4, %cst {dimension_numbers = #tpu.dot_dimension_numbers<[1], [0], [0], [1], [0, 0, 1, 1], [], []>} : vector<48x128xbf16>, vector<128x512xbf16>, vector<48x512xf32> -> vector<48x512xf32>
    %6 = vector.extract_strided_slice %5 {offsets = [0, 0], sizes = [48, 128], strides = [1, 1]} : vector<48x512xf32> to vector<48x128xf32>
    %7 = vector.extract_strided_slice %5 {offsets = [0, 128], sizes = [48, 128], strides = [1, 1]} : vector<48x512xf32> to vector<48x128xf32>
    %8 = vector.extract_strided_slice %7 {offsets = [1, 0], sizes = [47, 128], strides = [1, 1]} : vector<48x128xf32> to vector<47x128xf32>
    %9 = vector.extract_strided_slice %7 {offsets = [0, 0], sizes = [1, 128], strides = [1, 1]} : vector<48x128xf32> to vector<1x128xf32>
    %10 = tpu.concatenate %8, %9 in 0 : vector<47x128xf32>, vector<1x128xf32> -> vector<48x128xf32>
    %11 = arith.addf %6, %10 : vector<48x128xf32>
    %12 = vector.extract_strided_slice %5 {offsets = [0, 256], sizes = [48, 128], strides = [1, 1]} : vector<48x512xf32> to vector<48x128xf32>
    %13 = vector.extract_strided_slice %12 {offsets = [2, 0], sizes = [46, 128], strides = [1, 1]} : vector<48x128xf32> to vector<46x128xf32>
    %14 = vector.extract_strided_slice %12 {offsets = [0, 0], sizes = [2, 128], strides = [1, 1]} : vector<48x128xf32> to vector<2x128xf32>
    %15 = tpu.concatenate %13, %14 in 0 : vector<46x128xf32>, vector<2x128xf32> -> vector<48x128xf32>
    %16 = arith.addf %11, %15 : vector<48x128xf32>
    %17 = vector.extract_strided_slice %5 {offsets = [0, 384], sizes = [48, 128], strides = [1, 1]} : vector<48x512xf32> to vector<48x128xf32>
    %18 = vector.extract_strided_slice %17 {offsets = [1, 0], sizes = [47, 128], strides = [1, 1]} : vector<48x128xf32> to vector<47x128xf32>
    %19 = vector.extract_strided_slice %17 {offsets = [0, 0], sizes = [1, 128], strides = [1, 1]} : vector<48x128xf32> to vector<1x128xf32>
    %20 = tpu.concatenate %18, %19 in 0 : vector<47x128xf32>, vector<1x128xf32> -> vector<48x128xf32>
    %21 = vector.broadcast %2 : vector<48x1xf32> to vector<48x128xf32>
    %22 = arith.mulf %16, %21 : vector<48x128xf32>
    %c0_9 = arith.constant 0 : index
    %c0_10 = arith.constant 0 : index
    %23 = vector.load %arg6[%c0_9, %c0_10] : memref<1x8xf32, #tpu.memory_space<vmem>>, vector<1x8xf32>
    %c0_11 = arith.constant 0 : index
    %c0_12 = arith.constant 0 : index
    %24 = vector.load %arg7[%c0_11, %c0_12] : memref<1x8xf32, #tpu.memory_space<vmem>>, vector<1x8xf32>
    %cst_13 = arith.constant dense<0.000000e+00> : vector<128xf32>
    %25 = vector.multi_reduction <add>, %22, %cst_13 [0] : vector<48x128xf32> to vector<128xf32>
    %26 = vector.shape_cast %25 : vector<128xf32> to vector<1x128xf32>
    %27 = arith.mulf %22, %22 : vector<48x128xf32>
    %cst_14 = arith.constant dense<0.000000e+00> : vector<128xf32>
    %28 = vector.multi_reduction <add>, %27, %cst_14 [0] : vector<48x128xf32> to vector<128xf32>
    %29 = vector.shape_cast %28 : vector<128xf32> to vector<1x128xf32>
    %cst_15 = arith.constant dense<0.000000e+00> : vector<1x8xf32>
    %30 = tpu.matmul %26, %0, %cst_15 {dimension_numbers = #tpu.dot_dimension_numbers<[1], [0], [0], [1], [0, 0, 1, 1], [], []>} : vector<1x128xf32>, vector<128x8xf32>, vector<1x8xf32> -> vector<1x8xf32>
    %cst_16 = arith.constant 5.120000e+02 : f32
    %31 = vector.broadcast %cst_16 : f32 to vector<1x8xf32>
    %32 = arith.divf %30, %31 : vector<1x8xf32>
    %cst_17 = arith.constant dense<0.000000e+00> : vector<1x8xf32>
    %33 = tpu.matmul %29, %0, %cst_17 {dimension_numbers = #tpu.dot_dimension_numbers<[1], [0], [0], [1], [0, 0, 1, 1], [], []>} : vector<1x128xf32>, vector<128x8xf32>, vector<1x8xf32> -> vector<1x8xf32>
    %cst_18 = arith.constant 5.120000e+02 : f32
    %34 = vector.broadcast %cst_18 : f32 to vector<1x8xf32>
    %35 = arith.divf %33, %34 : vector<1x8xf32>
    %36 = arith.mulf %32, %32 : vector<1x8xf32>
    %37 = arith.subf %35, %36 : vector<1x8xf32>
    %cst_19 = arith.constant 9.99999974E-6 : f32
    %38 = vector.broadcast %cst_19 : f32 to vector<1x8xf32>
    %39 = arith.addf %37, %38 : vector<1x8xf32>
    %40 = math.rsqrt %39 : vector<1x8xf32>
    %41 = arith.mulf %23, %40 : vector<1x8xf32>
    %42 = arith.mulf %32, %41 : vector<1x8xf32>
    %43 = arith.subf %24, %42 : vector<1x8xf32>
    %cst_20 = arith.constant dense<0.000000e+00> : vector<1x128xf32>
    %44 = tpu.matmul %41, %1, %cst_20 {dimension_numbers = #tpu.dot_dimension_numbers<[1], [0], [0], [1], [0, 0, 1, 1], [], []>} : vector<1x8xf32>, vector<8x128xf32>, vector<1x128xf32> -> vector<1x128xf32>
    %cst_21 = arith.constant dense<0.000000e+00> : vector<1x128xf32>
    %45 = tpu.matmul %43, %1, %cst_21 {dimension_numbers = #tpu.dot_dimension_numbers<[1], [0], [0], [1], [0, 0, 1, 1], [], []>} : vector<1x8xf32>, vector<8x128xf32>, vector<1x128xf32> -> vector<1x128xf32>
    %46 = vector.broadcast %44 : vector<1x128xf32> to vector<48x128xf32>
    %47 = arith.mulf %22, %46 : vector<48x128xf32>
    %48 = vector.broadcast %45 : vector<1x128xf32> to vector<48x128xf32>
    %49 = arith.addf %47, %48 : vector<48x128xf32>
    %cst_22 = arith.constant 0.000000e+00 : f32
    %50 = vector.broadcast %cst_22 : f32 to vector<48x128xf32>
    %51 = arith.maximumf %49, %50 : vector<48x128xf32>
    %52 = vector.broadcast %2 : vector<48x1xf32> to vector<48x128xf32>
    %53 = arith.mulf %51, %52 : vector<48x128xf32>
    %54 = arith.truncf %53 : vector<48x128xf32> to vector<48x128xbf16>
    %c0_23 = arith.constant 0 : index
    %c0_24 = arith.constant 0 : index
    %55 = vector.load %arg2[%c0_23, %c0_24] : memref<128x384xbf16, #tpu.memory_space<vmem>>, vector<128x384xbf16>
    %cst_25 = arith.constant dense<0.000000e+00> : vector<48x384xf32>
    %56 = tpu.matmul %54, %55, %cst_25 {dimension_numbers = #tpu.dot_dimension_numbers<[1], [0], [0], [1], [0, 0, 1, 1], [], []>} : vector<48x128xbf16>, vector<128x384xbf16>, vector<48x384xf32> -> vector<48x384xf32>
    %57 = vector.extract_strided_slice %56 {offsets = [0, 0], sizes = [48, 128], strides = [1, 1]} : vector<48x384xf32> to vector<48x128xf32>
    %58 = vector.extract_strided_slice %57 {offsets = [47, 0], sizes = [1, 128], strides = [1, 1]} : vector<48x128xf32> to vector<1x128xf32>
    %59 = vector.extract_strided_slice %57 {offsets = [0, 0], sizes = [47, 128], strides = [1, 1]} : vector<48x128xf32> to vector<47x128xf32>
    %60 = tpu.concatenate %58, %59 in 0 : vector<1x128xf32>, vector<47x128xf32> -> vector<48x128xf32>
    %61 = vector.extract_strided_slice %56 {offsets = [0, 128], sizes = [48, 128], strides = [1, 1]} : vector<48x384xf32> to vector<48x128xf32>
    %62 = arith.addf %60, %61 : vector<48x128xf32>
    %63 = vector.extract_strided_slice %56 {offsets = [0, 256], sizes = [48, 128], strides = [1, 1]} : vector<48x384xf32> to vector<48x128xf32>
    %64 = vector.extract_strided_slice %63 {offsets = [1, 0], sizes = [47, 128], strides = [1, 1]} : vector<48x128xf32> to vector<47x128xf32>
    %65 = vector.extract_strided_slice %63 {offsets = [0, 0], sizes = [1, 128], strides = [1, 1]} : vector<48x128xf32> to vector<1x128xf32>
    %66 = tpu.concatenate %64, %65 in 0 : vector<47x128xf32>, vector<1x128xf32> -> vector<48x128xf32>
    %67 = arith.addf %62, %66 : vector<48x128xf32>
    %68 = vector.broadcast %2 : vector<48x1xf32> to vector<48x128xf32>
    %69 = arith.mulf %67, %68 : vector<48x128xf32>
    %c0_26 = arith.constant 0 : index
    %c0_27 = arith.constant 0 : index
    %70 = vector.load %arg8[%c0_26, %c0_27] : memref<1x8xf32, #tpu.memory_space<vmem>>, vector<1x8xf32>
    %c0_28 = arith.constant 0 : index
    %c0_29 = arith.constant 0 : index
    %71 = vector.load %arg9[%c0_28, %c0_29] : memref<1x8xf32, #tpu.memory_space<vmem>>, vector<1x8xf32>
    %cst_30 = arith.constant dense<0.000000e+00> : vector<128xf32>
    %72 = vector.multi_reduction <add>, %69, %cst_30 [0] : vector<48x128xf32> to vector<128xf32>
    %73 = vector.shape_cast %72 : vector<128xf32> to vector<1x128xf32>
    %74 = arith.mulf %69, %69 : vector<48x128xf32>
    %cst_31 = arith.constant dense<0.000000e+00> : vector<128xf32>
    %75 = vector.multi_reduction <add>, %74, %cst_31 [0] : vector<48x128xf32> to vector<128xf32>
    %76 = vector.shape_cast %75 : vector<128xf32> to vector<1x128xf32>
    %cst_32 = arith.constant dense<0.000000e+00> : vector<1x8xf32>
    %77 = tpu.matmul %73, %0, %cst_32 {dimension_numbers = #tpu.dot_dimension_numbers<[1], [0], [0], [1], [0, 0, 1, 1], [], []>} : vector<1x128xf32>, vector<128x8xf32>, vector<1x8xf32> -> vector<1x8xf32>
    %cst_33 = arith.constant 5.120000e+02 : f32
    %78 = vector.broadcast %cst_33 : f32 to vector<1x8xf32>
    %79 = arith.divf %77, %78 : vector<1x8xf32>
    %cst_34 = arith.constant dense<0.000000e+00> : vector<1x8xf32>
    %80 = tpu.matmul %76, %0, %cst_34 {dimension_numbers = #tpu.dot_dimension_numbers<[1], [0], [0], [1], [0, 0, 1, 1], [], []>} : vector<1x128xf32>, vector<128x8xf32>, vector<1x8xf32> -> vector<1x8xf32>
    %cst_35 = arith.constant 5.120000e+02 : f32
    %81 = vector.broadcast %cst_35 : f32 to vector<1x8xf32>
    %82 = arith.divf %80, %81 : vector<1x8xf32>
    %83 = arith.mulf %79, %79 : vector<1x8xf32>
    %84 = arith.subf %82, %83 : vector<1x8xf32>
    %cst_36 = arith.constant 9.99999974E-6 : f32
    %85 = vector.broadcast %cst_36 : f32 to vector<1x8xf32>
    %86 = arith.addf %84, %85 : vector<1x8xf32>
    %87 = math.rsqrt %86 : vector<1x8xf32>
    %88 = arith.mulf %70, %87 : vector<1x8xf32>
    %89 = arith.mulf %79, %88 : vector<1x8xf32>
    %90 = arith.subf %71, %89 : vector<1x8xf32>
    %cst_37 = arith.constant dense<0.000000e+00> : vector<1x128xf32>
    %91 = tpu.matmul %88, %1, %cst_37 {dimension_numbers = #tpu.dot_dimension_numbers<[1], [0], [0], [1], [0, 0, 1, 1], [], []>} : vector<1x8xf32>, vector<8x128xf32>, vector<1x128xf32> -> vector<1x128xf32>
    %cst_38 = arith.constant dense<0.000000e+00> : vector<1x128xf32>
    %92 = tpu.matmul %90, %1, %cst_38 {dimension_numbers = #tpu.dot_dimension_numbers<[1], [0], [0], [1], [0, 0, 1, 1], [], []>} : vector<1x8xf32>, vector<8x128xf32>, vector<1x128xf32> -> vector<1x128xf32>
    %93 = vector.broadcast %91 : vector<1x128xf32> to vector<48x128xf32>
    %94 = arith.mulf %69, %93 : vector<48x128xf32>
    %95 = vector.broadcast %92 : vector<1x128xf32> to vector<48x128xf32>
    %96 = arith.addf %94, %95 : vector<48x128xf32>
    %c0_39 = arith.constant 0 : index
    %c0_40 = arith.constant 0 : index
    %97 = vector.load %arg10[%c0_39, %c0_40] : memref<1x8xf32, #tpu.memory_space<vmem>>, vector<1x8xf32>
    %c0_41 = arith.constant 0 : index
    %c0_42 = arith.constant 0 : index
    %98 = vector.load %arg11[%c0_41, %c0_42] : memref<1x8xf32, #tpu.memory_space<vmem>>, vector<1x8xf32>
    %cst_43 = arith.constant dense<0.000000e+00> : vector<128xf32>
    %99 = vector.multi_reduction <add>, %20, %cst_43 [0] : vector<48x128xf32> to vector<128xf32>
    %100 = vector.shape_cast %99 : vector<128xf32> to vector<1x128xf32>
    %101 = arith.mulf %20, %20 : vector<48x128xf32>
    %cst_44 = arith.constant dense<0.000000e+00> : vector<128xf32>
    %102 = vector.multi_reduction <add>, %101, %cst_44 [0] : vector<48x128xf32> to vector<128xf32>
    %103 = vector.shape_cast %102 : vector<128xf32> to vector<1x128xf32>
    %cst_45 = arith.constant dense<0.000000e+00> : vector<1x8xf32>
    %104 = tpu.matmul %100, %0, %cst_45 {dimension_numbers = #tpu.dot_dimension_numbers<[1], [0], [0], [1], [0, 0, 1, 1], [], []>} : vector<1x128xf32>, vector<128x8xf32>, vector<1x8xf32> -> vector<1x8xf32>
    %cst_46 = arith.constant 5.120000e+02 : f32
    %105 = vector.broadcast %cst_46 : f32 to vector<1x8xf32>
    %106 = arith.divf %104, %105 : vector<1x8xf32>
    %cst_47 = arith.constant dense<0.000000e+00> : vector<1x8xf32>
    %107 = tpu.matmul %103, %0, %cst_47 {dimension_numbers = #tpu.dot_dimension_numbers<[1], [0], [0], [1], [0, 0, 1, 1], [], []>} : vector<1x128xf32>, vector<128x8xf32>, vector<1x8xf32> -> vector<1x8xf32>
    %cst_48 = arith.constant 5.120000e+02 : f32
    %108 = vector.broadcast %cst_48 : f32 to vector<1x8xf32>
    %109 = arith.divf %107, %108 : vector<1x8xf32>
    %110 = arith.mulf %106, %106 : vector<1x8xf32>
    %111 = arith.subf %109, %110 : vector<1x8xf32>
    %cst_49 = arith.constant 9.99999974E-6 : f32
    %112 = vector.broadcast %cst_49 : f32 to vector<1x8xf32>
    %113 = arith.addf %111, %112 : vector<1x8xf32>
    %114 = math.rsqrt %113 : vector<1x8xf32>
    %115 = arith.mulf %97, %114 : vector<1x8xf32>
    %116 = arith.mulf %106, %115 : vector<1x8xf32>
    %117 = arith.subf %98, %116 : vector<1x8xf32>
    %cst_50 = arith.constant dense<0.000000e+00> : vector<1x128xf32>
    %118 = tpu.matmul %115, %1, %cst_50 {dimension_numbers = #tpu.dot_dimension_numbers<[1], [0], [0], [1], [0, 0, 1, 1], [], []>} : vector<1x8xf32>, vector<8x128xf32>, vector<1x128xf32> -> vector<1x128xf32>
    %cst_51 = arith.constant dense<0.000000e+00> : vector<1x128xf32>
    %119 = tpu.matmul %117, %1, %cst_51 {dimension_numbers = #tpu.dot_dimension_numbers<[1], [0], [0], [1], [0, 0, 1, 1], [], []>} : vector<1x8xf32>, vector<8x128xf32>, vector<1x128xf32> -> vector<1x128xf32>
    %120 = vector.broadcast %118 : vector<1x128xf32> to vector<48x128xf32>
    %121 = arith.mulf %20, %120 : vector<48x128xf32>
    %122 = vector.broadcast %119 : vector<1x128xf32> to vector<48x128xf32>
    %123 = arith.addf %121, %122 : vector<48x128xf32>
    %124 = arith.addf %96, %123 : vector<48x128xf32>
    %cst_52 = arith.constant 0.000000e+00 : f32
    %125 = vector.broadcast %cst_52 : f32 to vector<48x128xf32>
    %126 = arith.maximumf %124, %125 : vector<48x128xf32>
    %c0_53 = arith.constant 0 : index
    %c0_54 = arith.constant 0 : index
    %127 = vector.load %arg12[%c0_53, %c0_54] : memref<48x128xf32, #tpu.memory_space<vmem>>, vector<48x128xf32>
    tpu.vector_store %arg12[%c0_53, %c0_54], %126 {strides = array<i32>} : memref<48x128xf32, #tpu.memory_space<vmem>>, vector<48x128xf32>,
    return
  }
}

</mosaic_0001>

<bundles_post_ra>
// kernel: tpu_custom_call.1
= control target key start
LH: loop header
LB: loop body
LE: loop exit
PB: predicated region body
PF: predicated region fallthrough
CT: control target
= control target key end

     0   :  { %17 = vsyncpa [#allocation3], 0  ;;  %s3427_s0 = inlined_call_operand.hbm [shape: bf16[48,128], index: 0, kind: input, shape index: {}]   ;;  %s3428_s1 = inlined_call_operand.hbm [shape: bf16[128,512], index: 1, kind: input, shape index: {}]   ;;  %s3429_s2 = inlined_call_operand.vmem [shape: bf16[128,384], index: 2, kind: input, shape index: {}]   ;;  %s3430_s3 = inlined_call_operand.vmem [shape: f32[128,8], index: 3, kind: input, shape index: {}]   ;;  %s3431_s4 = inlined_call_operand.vmem [shape: f32[8,128], index: 4, kind: input, shape index: {}]   ;;  %s3432_s5 = inlined_call_operand.vmem [shape: f32[48,1], index: 5, kind: input, shape index: {}]   ;;  %s3433_s6 = inlined_call_operand.vmem [shape: f32[1,8], index: 6, kind: input, shape index: {}]   ;;  %s3434_s7 = inlined_call_operand.vmem [shape: f32[1,8], index: 7, kind: input, shape index: {}]   ;;  %s3435_s8 = inlined_call_operand.vmem [shape: f32[1,8], index: 8, kind: input, shape index: {}]   ;;  %s3436_s9 = inlined_call_operand.vmem [shape: f32[1,8], index: 9, kind: input, shape index: {}]   ;;  %s3437_s10 = inlined_call_operand.vmem [shape: f32[1,8], index: 10, kind: input, shape index: {}]   ;;  %s3438_s11 = inlined_call_operand.vmem [shape: f32[1,8], index: 11, kind: input, shape index: {}]   ;;  %s3439_s12 = inlined_call_operand.hbm [shape: f32[48,128], index: 12, kind: output, shape index: {}]  }
   0x1   :  { %18 = vsyncpa [#allocation6], 0 }
   0x2   :  { %19 = vsyncpa [#allocation4], 0  ;;  %s2776_s21 = smov [#allocation2]   ;;  %s2704_s25 = scalar_lea.hbm %s3427_s0, 384 }
   0x3   :  { %s25_s22 = sshll.u32 %s2776_s21, 4  ;;  %p2705_p0 = scmp.ne.s32.totalorder %s3427_s0, %s2704_s25  ;;  %s26_s22 = int_to_ptr.vmem [resolvable:$true] %s25_s22 }
   0x4   :  { %p2708_p1 = scmp.lt.u32.totalorder %s2704_s25, %s3427_s0 }
   0x6   :  { %p2710_p2 = pnand %p2708_p1, %p2705_p0 }
   0x8   :  { %2713 = shalt.err (!%p2710_p2)
}
   0x9   :  { %s2714_s30 = scalar_lea.vmem %s26_s22, 384  ;;  %p2719_p4 = scmp.lt.s32.totalorder %s26_s22, %s26_s22 }
   0xa   :  { %p2715_p3 = scmp.ne.s32.totalorder %s26_s22, %s2714_s30  ;;  %p2720_p5 = scmp.lt.s32.totalorder %s2714_s30, %s2714_s30 }
   0xc   :  { %p2721_p6 = por %p2720_p5, %p2719_p4 }
   0xe   :  { %p2722_p7 = pnand %p2721_p6, %p2715_p3 }
  0x10   :  { %2725 = shalt.err (!%p2722_p7)
}
  0x11   :  { %s2777_s13 = smov 64   ;;  %s2778_s14 = smov 4  }
  0x12   :  { %31 = dma.hbm_to_vmem [thread:$0]  %s3427_s0, 384, %s26_s22, [#allocation3], %s2777_s13, %s2777_s13, %s2778_s14  }
  0x13   :  { %s2779_s17 = smov [#allocation5]   ;;  %s2726_s21 = scalar_lea.hbm %s3428_s1, 4096 }
  0x14   :  { %s37_s18 = sshll.u32 %s2779_s17, 4  ;;  %p2727_p8 = scmp.ne.s32.totalorder %s3428_s1, %s2726_s21  ;;  %s38_s18 = int_to_ptr.vmem [resolvable:$true] %s37_s18 }
  0x15   :  { %p2730_p9 = scmp.lt.u32.totalorder %s2726_s21, %s3428_s1 }
  0x17   :  { %p2732_p10 = pnand %p2730_p9, %p2727_p8 }
  0x19   :  { %2735 = shalt.err (!%p2732_p10)
}
  0x1a   :  { %s2736_s27 = scalar_lea.vmem %s38_s18, 4096  ;;  %p2741_p12 = scmp.lt.s32.totalorder %s38_s18, %s38_s18 }
  0x1b   :  { %p2737_p11 = scmp.ne.s32.totalorder %s38_s18, %s2736_s27  ;;  %p2742_p13 = scmp.lt.s32.totalorder %s2736_s27, %s2736_s27 }
  0x1d   :  { %p2743_p0 = por %p2742_p13, %p2741_p12 }
  0x1f   :  { %p2744_p1 = pnand %p2743_p0, %p2737_p11 }
  0x21   :  { %2747 = shalt.err (!%p2744_p1)
}
  0x22   :  { %s2780_s0 = smov 256   ;;  %s2781_s22 = smov 16  }
  0x23   :  { %43 = dma.hbm_to_vmem [thread:$0]  %s3428_s1, 4096, %s38_s18, [#allocation6], %s2780_s0, %s2780_s0, %s2781_s22  }
  0x24   :  { %2770 = dma.done.wait [#allocation3], 384  }
  0x25   :  { %2771 = vsyncadd [#allocation3], 4294966912 }
  0x26   :  { %2772 = dma.done.wait [#allocation6], 4096  }
  0x27   :  { %2773 = vsyncadd [#allocation6], 4294963200  ;;  %v2782_v0 = vmov 0   ;;  %v2615_v1 = vld [vmem:[#allocation5 + $0x4] ss:$16 sps:$4 sm:$0xff]   ;;  %v88_v29 = vld [vmem:[%s3432_s5] sm:$0xff] }
  0x28   :  { %342 = vmatprep.mubr.bf16.mxu0 %v2782_v0  ;;  %405 = vmatprep.mubr.bf16.mxu1 %v2782_v0  ;;  %v2617_v2 = vld [vmem:[#allocation5 + $0xc] ss:$16 sps:$4 sm:$0xff]   ;;  %v2619_v3 = vld [vmem:[#allocation5] ss:$16 sps:$4 sm:$0xff]   ;;  %v2620_v4 = vld [vmem:[#allocation5 + $0x8] ss:$16 sps:$4 sm:$0xff]  }
  0x29   :  { %2613 = vset.pattern.permute.xlu0 %v2782_v0  ;;  %2614 = vset.pattern.permute.xlu1 %v2782_v0  ;;  %v2621_v5 = vld [vmem:[#allocation5 + $0x24] ss:$16 sps:$4 sm:$0xff]   ;;  %v2623_v6 = vld [vmem:[#allocation5 + $0x2c] ss:$16 sps:$4 sm:$0xff]   ;;  %v2625_v7 = vld [vmem:[#allocation5 + $0x20] ss:$16 sps:$4 sm:$0xff]  }
  0x2a   :  { %310 = vmatprep.subr.bf16.mxu0 %v2615_v1  ;;  %373 = vmatprep.subr.bf16.mxu1 %v2617_v2  ;;  %v2626_v8 = vld [vmem:[#allocation5 + $0x28] ss:$16 sps:$4 sm:$0xff]   ;;  %v2627_v9 = vld [vmem:[#allocation5 + $0x44] ss:$16 sps:$4 sm:$0xff]   ;;  %v2629_v10 = vld [vmem:[#allocation5 + $0x4c] ss:$16 sps:$4 sm:$0xff]  }
  0x2b   :  { %311 = vmatpush1.bf16.msra.mxu0 %v2619_v3  ;;  %374 = vmatpush1.bf16.msra.mxu1 %v2620_v4  ;;  %v2631_v11 = vld [vmem:[#allocation5 + $0x40] ss:$16 sps:$4 sm:$0xff]   ;;  %v2632_v12 = vld [vmem:[#allocation5 + $0x48] ss:$16 sps:$4 sm:$0xff]   ;;  %v2633_v13 = vld [vmem:[#allocation5 + $0x64] ss:$16 sps:$4 sm:$0xff]  }
  0x2c   :  { %312 = vmatprep.subr.bf16.mxu0 %v2621_v5  ;;  %375 = vmatprep.subr.bf16.mxu1 %v2623_v6  ;;  %v2635_v14 = vld [vmem:[#allocation5 + $0x6c] ss:$16 sps:$4 sm:$0xff]   ;;  %v2637_v15 = vld [vmem:[#allocation5 + $0x60] ss:$16 sps:$4 sm:$0xff]   ;;  %v2638_v16 = vld [vmem:[#allocation5 + $0x68] ss:$16 sps:$4 sm:$0xff]  }
  0x2d   :  { %v2639_v17 = vld [vmem:[#allocation5 + $0x84] ss:$16 sps:$4 sm:$0xff]   ;;  %v2641_v18 = vld [vmem:[#allocation5 + $0x8c] ss:$16 sps:$4 sm:$0xff]   ;;  %v2643_v19 = vld [vmem:[#allocation5 + $0x80] ss:$16 sps:$4 sm:$0xff]   ;;  %527 = vperm.xlu0 %2613, %v88_v29  }
  0x2e   :  { %v2644_v20 = vld [vmem:[#allocation5 + $0x88] ss:$16 sps:$4 sm:$0xff]   ;;  %v2645_v21 = vld [vmem:[#allocation5 + $0xa4] ss:$16 sps:$4 sm:$0xff]   ;;  %v2647_v22 = vld [vmem:[#allocation5 + $0xac] ss:$16 sps:$4 sm:$0xff]  }
  0x2f   :  { %313 = vmatpush1.bf16.msra.mxu0 %v2625_v7  ;;  %376 = vmatpush1.bf16.msra.mxu1 %v2626_v8  ;;  %v2649_v23 = vld [vmem:[#allocation5 + $0xa0] ss:$16 sps:$4 sm:$0xff]   ;;  %v2650_v24 = vld [vmem:[#allocation5 + $0xa8] ss:$16 sps:$4 sm:$0xff]   ;;  %v2651_v25 = vld [vmem:[#allocation5 + $0xc4] ss:$16 sps:$4 sm:$0xff]  }
  0x30   :  { %314 = vmatprep.subr.bf16.mxu0 %v2627_v9  ;;  %377 = vmatprep.subr.bf16.mxu1 %v2629_v10  ;;  %v2653_v26 = vld [vmem:[#allocation5 + $0xcc] ss:$16 sps:$4 sm:$0xff]   ;;  %v2655_v27 = vld [vmem:[#allocation5 + $0xc0] ss:$16 sps:$4 sm:$0xff]   ;;  %v2656_v28 = vld [vmem:[#allocation5 + $0xc8] ss:$16 sps:$4 sm:$0xff]  }
  0x31   :  { %v90_v30 = vld [vmem:[%s3432_s5 + $0x10] sm:$0xff]  ;;  %v2657_v31 = vld [vmem:[#allocation5 + $0xe4] ss:$16 sps:$4 sm:$0xff]   ;;  %v2661_v34 = vld [vmem:[#allocation5 + $0xe0] ss:$16 sps:$4 sm:$0xff]   ;;  %v2783_v45 = vmov 0.0|0.0  }
  0x32   :  { %v2659_v32 = vld [vmem:[#allocation5 + $0xec] ss:$16 sps:$4 sm:$0xff]   ;;  %v89_v33 = vld [vmem:[%s3432_s5 + $0x8] sm:$0xff]  ;;  %v2662_v35 = vld [vmem:[#allocation5 + $0xe8] ss:$16 sps:$4 sm:$0xff]   ;;  %537 = vperm.xlu1 %2614, %v90_v30   ;;  %vm2784_vm0 = vmmov 0  }
  0x33   :  { %315 = vmatpush1.bf16.msra.mxu0 %v2631_v11  ;;  %378 = vmatpush1.bf16.msra.mxu1 %v2632_v12  ;;  %v91_v36 = vld [vmem:[%s3432_s5 + $0x18] sm:$0xff]  ;;  %v2663_v37 = vld [vmem:[#allocation2] sm:$0xff]   ;;  %v93_v39 = vld [vmem:[%s3432_s5 + $0x28] sm:$0xff]  ;;  %v2785_v4 = vmov 0.0   ;;  %vm474_vm1 = vcmask 1045504   ;;  %vm442_vm2 = vcmask 1046528  }
  0x34   :  { %316 = vmatprep.subr.bf16.mxu0 %v2633_v13  ;;  %379 = vmatprep.subr.bf16.mxu1 %v2635_v14  ;;  %v92_v38 = vld [vmem:[%s3432_s5 + $0x20] sm:$0xff]  ;;  %v2664_v40 = vld [vmem:[#allocation2 + $0x8] sm:$0xff]   ;;  %v2665_v41 = vld [vmem:[#allocation2 + $0x10] sm:$0xff]   ;;  %vm741_vm3 = vcmask 64512   ;;  %vm1211_vm4 = vcmask 1040384  }
  0x35   :  { %532 = vperm.xlu0 %2613, %v89_v33   ;;  %v71_v42 = vld [vmem:[%s3430_s3] sm:$0xff]  ;;  %v72_v43 = vld [vmem:[%s3430_s3 + $0x8] sm:$0xff]  ;;  %v73_v46 = vld [vmem:[%s3430_s3 + $0x10] sm:$0xff] }
  0x36   :  { %542 = vperm.xlu1 %2614, %v91_v36   ;;  %v2910_v44 = vpack.c.bf16 %v72_v43, %v71_v42  ;;  %v74_v47 = vld [vmem:[%s3430_s3 + $0x18] sm:$0xff]  ;;  %v75_v49 = vld [vmem:[%s3430_s3 + $0x20] sm:$0xff]  ;;  %v76_v50 = vld [vmem:[%s3430_s3 + $0x28] sm:$0xff] }
  0x37   :  { %317 = vmatpush1.bf16.msra.mxu0 %v2637_v15  ;;  %380 = vmatpush1.bf16.msra.mxu1 %v2638_v16  ;;  %v2924_v48 = vpack.c.bf16 %v74_v47, %v73_v46  ;;  %v2936_v51 = vpack.c.bf16 %v76_v50, %v75_v49  ;;  %v77_v52 = vld [vmem:[%s3430_s3 + $0x30] sm:$0xff]  ;;  %v78_v53 = vld [vmem:[%s3430_s3 + $0x38] sm:$0xff]  ;;  %v79_v55 = vld [vmem:[%s3430_s3 + $0x40] sm:$0xff] }
  0x38   :  { %318 = vmatprep.subr.bf16.mxu0 %v2639_v17  ;;  %381 = vmatprep.subr.bf16.mxu1 %v2641_v18  ;;  %v2948_v54 = vpack.c.bf16 %v78_v53, %v77_v52  ;;  %v80_v56 = vld [vmem:[%s3430_s3 + $0x48] sm:$0xff]  ;;  %v81_v58 = vld [vmem:[%s3430_s3 + $0x50] sm:$0xff]  ;;  %v82_v59 = vld [vmem:[%s3430_s3 + $0x58] sm:$0xff] }
  0x39   :  { %547 = vperm.xlu0 %2613, %v92_v38   ;;  %v2960_v57 = vpack.c.bf16 %v80_v56, %v79_v55  ;;  %v2972_v60 = vpack.c.bf16 %v82_v59, %v81_v58  ;;  %v83_v61 = vld [vmem:[%s3430_s3 + $0x60] sm:$0xff]  ;;  %v84_v62 = vld [vmem:[%s3430_s3 + $0x68] sm:$0xff]  ;;  %v85_v1 = vld [vmem:[%s3430_s3 + $0x70] sm:$0xff] }
  0x3a   :  { %552 = vperm.xlu1 %2614, %v93_v39   ;;  %v2984_v63 = vpack.c.bf16 %v84_v62, %v83_v61  ;;  %v86_v2 = vld [vmem:[%s3430_s3 + $0x78] sm:$0xff] }
  0x3b   :  { %319 = vmatpush1.bf16.msra.mxu0 %v2643_v19  ;;  %382 = vmatpush1.bf16.msra.mxu1 %v2644_v20  ;;  %v2996_v3 = vpack.c.bf16 %v86_v2, %v85_v1 }
  0x3c   :  { %320 = vmatprep.subr.bf16.mxu0 %v2645_v21  ;;  %383 = vmatprep.subr.bf16.mxu1 %v2647_v22 }
  0x3f   :  { %321 = vmatpush1.bf16.msra.mxu0 %v2649_v23  ;;  %384 = vmatpush1.bf16.msra.mxu1 %v2650_v24 }
  0x40   :  { %322 = vmatprep.subr.bf16.mxu0 %v2651_v25  ;;  %385 = vmatprep.subr.bf16.mxu1 %v2653_v26 }
  0x43   :  { %323 = vmatpush1.bf16.msra.mxu0 %v2655_v27  ;;  %386 = vmatpush1.bf16.msra.mxu1 %v2656_v28 }
  0x44   :  { %324 = vmatprep.subr.bf16.mxu0 %v2657_v31  ;;  %387 = vmatprep.subr.bf16.mxu1 %v2659_v32 }
  0x47   :  { %325 = vmatpush1.bf16.msra.mxu0 %v2661_v34  ;;  %388 = vmatpush1.bf16.msra.mxu1 %v2662_v35 }
  0x48   :  { %2456 = vmatprep.subr.bf16.mxu0 %v2783_v45  ;;  %2480 = vmatprep.subr.bf16.mxu1 %v2783_v45 }
  0x4a   :  { %343 = vmatmul.mubr.bf16.vlgmr.msra.gmra.mrb[0].mxu0 %v2663_v37  ;;  %406 = vmatmul.mubr.bf16.vlgmr.msra.gmra.mrb[0].mxu1 %v2663_v37 }
  0x4b   :  { %352 = vmatprep.mubr.bf16.mxu0 %v2782_v0  ;;  %415 = vmatprep.mubr.bf16.mxu1 %v2782_v0 }
  0x4c   :  { %2458 = vmatpush3.bf16.msra.mxu0 %v2910_v44  ;;  %2482 = vmatpush3.bf16.msra.mxu1 %v2910_v44 }
  0x4d   :  { %2459 = vmatprep.subr.bf16.mxu0 %v2783_v45  ;;  %2483 = vmatprep.subr.bf16.mxu1 %v2783_v45 }
  0x50   :  { %2461 = vmatpush3.bf16.msra.mxu0 %v2924_v48  ;;  %2485 = vmatpush3.bf16.msra.mxu1 %v2924_v48 }
  0x51   :  { %2462 = vmatprep.subr.bf16.mxu0 %v2783_v45  ;;  %2486 = vmatprep.subr.bf16.mxu1 %v2783_v45 }
  0x52   :  { %353 = vmatmul.mubr.bf16.gmra.mrb[4].mxu0 %v2664_v40  ;;  %416 = vmatmul.mubr.bf16.gmra.mrb[4].mxu1 %v2664_v40 }
  0x53   :  { %362 = vmatprep.mubr.bf16.mxu0 %v2782_v0  ;;  %425 = vmatprep.mubr.bf16.mxu1 %v2782_v0 }
  0x54   :  { %2464 = vmatpush3.bf16.msra.mxu0 %v2936_v51  ;;  %2488 = vmatpush3.bf16.msra.mxu1 %v2936_v51 }
  0x55   :  { %2465 = vmatprep.subr.bf16.mxu0 %v2783_v45  ;;  %2489 = vmatprep.subr.bf16.mxu1 %v2783_v45 }
  0x58   :  { %2467 = vmatpush3.bf16.msra.mxu0 %v2948_v54  ;;  %2491 = vmatpush3.bf16.msra.mxu1 %v2948_v54 }
  0x59   :  { %2468 = vmatprep.subr.bf16.mxu0 %v2783_v45  ;;  %2492 = vmatprep.subr.bf16.mxu1 %v2783_v45 }
  0x5a   :  { %363 = vmatmul.mubr.bf16.gmra.mrb[8].mxu0 %v2665_v41  ;;  %426 = vmatmul.mubr.bf16.gmra.mrb[8].mxu1 %v2665_v41 }
  0x5b   :  { %2220 = vmatprep.mubr.msk.f32.mxu0 %vm2784_vm0, %v2785_v4  ;;  %2255 = vmatprep.mubr.msk.f32.mxu1 %vm2784_vm0, %v2785_v4 }
  0x5c   :  { %2470 = vmatpush3.bf16.msra.mxu0 %v2960_v57  ;;  %2494 = vmatpush3.bf16.msra.mxu1 %v2960_v57 }
  0x5d   :  { %2471 = vmatprep.subr.bf16.mxu0 %v2783_v45  ;;  %2495 = vmatprep.subr.bf16.mxu1 %v2783_v45 }
  0x60   :  { %2473 = vmatpush3.bf16.msra.mxu0 %v2972_v60  ;;  %2497 = vmatpush3.bf16.msra.mxu1 %v2972_v60 }
  0x61   :  { %2474 = vmatprep.subr.bf16.mxu0 %v2783_v45  ;;  %2498 = vmatprep.subr.bf16.mxu1 %v2783_v45 }
  0x64   :  { %2476 = vmatpush3.bf16.msra.mxu0 %v2984_v63  ;;  %2500 = vmatpush3.bf16.msra.mxu1 %v2984_v63 }
  0x65   :  { %2477 = vmatprep.subr.bf16.mxu0 %v2783_v45  ;;  %2501 = vmatprep.subr.bf16.mxu1 %v2783_v45 }
  0x68   :  { %2479 = vmatpush3.bf16.msra.mxu0 %v2996_v3  ;;  %2503 = vmatpush3.bf16.msra.mxu1 %v2996_v3 }
  0x69   :  { %2258 = vmatprep.subr.mxu0 %v2785_v4  ;;  %2263 = vmatprep.subr.mxu1 %v2785_v4 }
  0xac   :  { %v3026_v23 = vpop.permute.xlu0 %527 }
  0xb1   :  { %v3038_v50 = vpop.permute.xlu1 %537 }
  0xb4   :  { %v3040_v52 = vpop.permute.xlu0 %532 }
 0x11d   :  { %v344_v5 = vpop.f32.mrb[0].mxu0  ;;  %v3006_v6 = vpop.f32.mrb[0].mxu1 }
 0x11e   :  { %v475_v7 = vrot.slane %v3006_v6, 2  ;;  %v3009_v8 = vpop.f32.mrb[1].mxu0  ;;  %v3011_v9 = vpop.f32.mrb[1].mxu1 }
 0x11f   :  { %v506_v10 = vrot.slane %v3011_v9, 1  ;;  %v348_v11 = vpop.f32.mrb[2].mxu0  ;;  %v411_v12 = vpop.f32.mrb[2].mxu1  ;;  %v443_v16 = vrot.slane %v3009_v8, 1 }
 0x120   :  { %v476_v13 = vrot.slane %v411_v12, 2  ;;  %v350_v14 = vpop.f32.mrb[3].mxu0  ;;  %v413_v15 = vpop.f32.mrb[3].mxu1 }
 0x121   :  { %v444_v17 = vrot.slane %v350_v14, 1  ;;  %v507_v18 = vrot.slane %v413_v15, 1 }
 0x122   :  { %v477_v19 = vsel %vm474_vm1, %v475_v7, %v476_v13 }
 0x123   :  { %v445_v20 = vsel %vm442_vm2, %v443_v16, %v444_v17  ;;  %v3024_v21 = vsel %vm442_vm2, %v506_v10, %v507_v18 }
 0x124   :  { %v462_v22 = vadd.f32 %v445_v20, %v344_v5 }
 0x125   :  { %v354_v24 = vpop.f32.mrb[4].mxu0  ;;  %v417_v25 = vpop.f32.mrb[4].mxu1 }
 0x126   :  { %v478_v26 = vrot.slane %v417_v25, 2  ;;  %v494_v27 = vadd.f32 %v477_v19, %v462_v22  ;;  %v356_v28 = vpop.f32.mrb[5].mxu0  ;;  %v419_v29 = vpop.f32.mrb[5].mxu1 }
 0x127   :  { %v446_v30 = vrot.slane %v356_v28, 1  ;;  %v509_v31 = vrot.slane %v419_v29, 1  ;;  %v358_v32 = vpop.f32.mrb[6].mxu0  ;;  %v421_v33 = vpop.f32.mrb[6].mxu1 }
 0x128   :  { %v479_v34 = vsel %vm474_vm1, %v476_v13, %v478_v26  ;;  %v480_v35 = vrot.slane %v421_v33, 2  ;;  %v360_v36 = vpop.f32.mrb[7].mxu0  ;;  %v423_v37 = vpop.f32.mrb[7].mxu1  ;;  %v3043_v58 = vmul.f32 %v3026_v23, %v494_v27 }
 0x129   :  { %v447_v38 = vsel %vm442_vm2, %v444_v17, %v446_v30  ;;  %v3031_v39 = vsel %vm442_vm2, %v507_v18, %v509_v31  ;;  %v448_v40 = vrot.slane %v360_v36, 1  ;;  %v511_v41 = vrot.slane %v423_v37, 1  ;;  %v3065_v33 = vpop.permute.xlu1 %542 }
 0x12a   :  { %v463_v42 = vadd.f32 %v447_v38, %v348_v11  ;;  %v481_v43 = vsel %vm474_vm1, %v478_v26, %v480_v35  ;;  %v574_v26 = vmul.f32 %v3043_v58, %v3043_v58 }
 0x12b   :  { %v449_v46 = vsel %vm442_vm2, %v446_v30, %v448_v40  ;;  %v3036_v47 = vsel %vm442_vm2, %v509_v31, %v511_v41 }
 0x12c   :  { %v464_v49 = vadd.f32 %v449_v46, %v354_v24  ;;  %v495_v53 = vadd.f32 %v479_v34, %v463_v42 }
 0x12d   :  { %v364_v55 = vpop.f32.mrb[8].mxu0  ;;  %v427_v56 = vpop.f32.mrb[8].mxu1 }
 0x12e   :  { %v496_v59 = vadd.f32 %v481_v43, %v464_v49  ;;  %v482_v61 = vrot.slane %v427_v56, 2  ;;  %v366_v62 = vpop.f32.mrb[9].mxu0  ;;  %v429_v1 = vpop.f32.mrb[9].mxu1  ;;  %v3046_v2 = vmul.f32 %v3040_v52, %v495_v53 }
 0x12f   :  { %v450_v5 = vrot.slane %v366_v62, 1  ;;  %v513_v11 = vrot.slane %v429_v1, 1  ;;  %v368_v12 = vpop.f32.mrb[10].mxu0  ;;  %v431_v13 = vpop.f32.mrb[10].mxu1 }
 0x130   :  { %v3049_v14 = vmul.f32 %v3038_v50, %v496_v59  ;;  %v483_v15 = vsel %vm474_vm1, %v480_v35, %v482_v61  ;;  %v484_v17 = vrot.slane %v431_v13, 2  ;;  %v370_v18 = vpop.f32.mrb[11].mxu0  ;;  %v433_v19 = vpop.f32.mrb[11].mxu1  ;;  %v563_v20 = vadd.f32 %v3046_v2, %v3043_v58 }
 0x131   :  { %v575_v22 = vmul.f32 %v3046_v2, %v3046_v2  ;;  %v451_v24 = vsel %vm442_vm2, %v448_v40, %v450_v5  ;;  %v3058_v25 = vsel %vm442_vm2, %v511_v41, %v513_v11  ;;  %v452_v30 = vrot.slane %v370_v18, 1  ;;  %v3089_v49 = vpop.permute.xlu0 %547  ;;  %v3094_v56 = vpop.permute.xlu1 %552 }
 0x132   :  { %v465_v27 = vadd.f32 %v451_v24, %v358_v32  ;;  %v576_v28 = vmul.f32 %v3049_v14, %v3049_v14  ;;  %v485_v29 = vsel %vm474_vm1, %v482_v61, %v484_v17  ;;  %v515_v35 = vrot.slane %v433_v19, 1 }
 0x133   :  { %v580_v31 = vadd.f32 %v575_v22, %v574_v26  ;;  %v493_v36 = vsel %vm474_vm1, %v484_v17, %v475_v7  ;;  %v564_v37 = vadd.f32 %v563_v20, %v3049_v14  ;;  %v453_v38 = vsel %vm442_vm2, %v450_v5, %v452_v30 }
 0x134   :  { %v497_v34 = vadd.f32 %v483_v15, %v465_v27  ;;  %v461_v32 = vsel %vm442_vm2, %v452_v30, %v443_v16  ;;  %v466_v41 = vadd.f32 %v453_v38, %v364_v55  ;;  %v3079_v42 = vsel %vm442_vm2, %v513_v11, %v515_v35  ;;  %v2668_v30 = vld [vmem:[%s3429_s2 + $0x4] ss:$12 sps:$4 sm:$0xff]  }
 0x135   :  { %v3084_v6 = vsel %vm442_vm2, %v515_v35, %v506_v10  ;;  %v467_v7 = vadd.f32 %v461_v32, %v368_v12  ;;  %v581_v43 = vadd.f32 %v580_v31, %v576_v28 }
 0x136   :  { %v3076_v40 = vmul.f32 %v3065_v33, %v497_v34  ;;  %v498_v46 = vadd.f32 %v485_v29, %v466_v41  ;;  %v3112_v29 = vld [vmem:[%s3431_s4] sm:$0xff] }
 0x137   :  { %v499_v53 = vadd.f32 %v493_v36, %v467_v7 }
 0x138   :  { %v577_v8 = vmul.f32 %v3076_v40, %v3076_v40  ;;  %v565_v16 = vadd.f32 %v564_v37, %v3076_v40  ;;  %v3092_v55 = vmul.f32 %v3089_v49, %v498_v46 }
 0x139   :  { %v3097_v10 = vmul.f32 %v3094_v56, %v499_v53  ;;  %v2672_v53 = vld [vmem:[%s3429_s2 + $0x1c] ss:$12 sps:$4 sm:$0xff]  }
 0x13a   :  { %v582_v9 = vadd.f32 %v581_v43, %v577_v8  ;;  %v566_v59 = vadd.f32 %v565_v16, %v3092_v55  ;;  %v578_v61 = vmul.f32 %v3092_v55, %v3092_v55  ;;  %v561_v43 = vld [vmem:[%s3433_s6] sm:$0x1] }
 0x13b   :  { %v579_v1 = vmul.f32 %v3097_v10, %v3097_v10  ;;  %v2666_v8 = vld [vmem:[%s3429_s2] ss:$12 sps:$4 sm:$0xff]  }
 0x13c   :  { %v567_v62 = vadd.f32 %v566_v59, %v3097_v10  ;;  %v583_v5 = vadd.f32 %v582_v9, %v578_v61  ;;  %v562_v9 = vld [vmem:[%s3434_s7] sm:$0x1]  ;;  %v2669_v61 = vld [vmem:[%s3429_s2 + $0x8] ss:$12 sps:$4 sm:$0xff]  }
 0x13e   :  { %v568_v11 = vrot.slane %v567_v62, 4  ;;  %v584_v12 = vadd.f32 %v583_v5, %v579_v1  ;;  %v2676_v5 = vld [vmem:[%s3429_s2 + $0x34] ss:$12 sps:$4 sm:$0xff]  }
 0x140   :  { %v569_v13 = vadd.f32 %v568_v11, %v567_v62  ;;  %v585_v15 = vrot.slane %v584_v12, 4  ;;  %v2670_v62 = vld [vmem:[%s3429_s2 + $0x18] ss:$12 sps:$4 sm:$0xff]   ;;  %v2673_v11 = vld [vmem:[%s3429_s2 + $0x20] ss:$12 sps:$4 sm:$0xff]  }
 0x142   :  { %v570_v17 = vrot.slane %v569_v13, 2  ;;  %v586_v18 = vadd.f32 %v585_v15, %v584_v12  ;;  %v2674_v12 = vld [vmem:[%s3429_s2 + $0x30] ss:$12 sps:$4 sm:$0xff]   ;;  %v2677_v15 = vld [vmem:[%s3429_s2 + $0x38] ss:$12 sps:$4 sm:$0xff]  }
 0x144   :  { %v571_v19 = vadd.f32 %v570_v17, %v569_v13  ;;  %v587_v20 = vrot.slane %v586_v18, 2  ;;  %v2680_v13 = vld [vmem:[%s3429_s2 + $0x4c] ss:$12 sps:$4 sm:$0xff]   ;;  %v2678_v17 = vld [vmem:[%s3429_s2 + $0x48] ss:$12 sps:$4 sm:$0xff]  }
 0x146   :  { %v572_v22 = vrot.slane %v571_v19, 1  ;;  %v588_v24 = vadd.f32 %v587_v20, %v586_v18  ;;  %v2684_v18 = vld [vmem:[%s3429_s2 + $0x64] ss:$12 sps:$4 sm:$0xff]   ;;  %v2682_v20 = vld [vmem:[%s3429_s2 + $0x60] ss:$12 sps:$4 sm:$0xff]  }
 0x148   :  { %v573_v26 = vadd.f32 %v572_v22, %v571_v19  ;;  %v589_v27 = vrot.slane %v588_v24, 1  ;;  %v2681_v19 = vld [vmem:[%s3429_s2 + $0x50] ss:$12 sps:$4 sm:$0xff]   ;;  %v2685_v22 = vld [vmem:[%s3429_s2 + $0x68] ss:$12 sps:$4 sm:$0xff]  }
 0x14a   :  { %2221 = vmatmul.mubr.f32.vlgmr.msra.gmra.mrb[12].mxu0 %v573_v26  ;;  %v590_v28 = vadd.f32 %v589_v27, %v588_v24  ;;  %v2686_v24 = vld [vmem:[%s3429_s2 + $0x78] ss:$12 sps:$4 sm:$0xff]   ;;  %v2688_v26 = vld [vmem:[%s3429_s2 + $0x7c] ss:$12 sps:$4 sm:$0xff]   ;;  %v2689_v27 = vld [vmem:[%s3429_s2 + $0x80] ss:$12 sps:$4 sm:$0xff]  }
 0x14b   :  { %2260 = vmatprep.mubr.msk.f32.mxu0 %vm2784_vm0, %v2785_v4  ;;  %2259 = vmatpush3.msra.mxu0 %v3112_v29 }
 0x14c   :  { %2256 = vmatmul.mubr.f32.vlgmr.msra.gmra.mrb[12].mxu1 %v590_v28  ;;  %1083 = vmatprep.subr.bf16.mxu0 %v2668_v30  ;;  %v2690_v28 = vld [vmem:[%s3429_s2 + $0x90] ss:$12 sps:$4 sm:$0xff]   ;;  %v2692_v30 = vld [vmem:[%s3429_s2 + $0x94] ss:$12 sps:$4 sm:$0xff]  }
 0x14d   :  { %2265 = vmatprep.mubr.msk.f32.mxu1 %vm2784_vm0, %v2785_v4  ;;  %2264 = vmatpush3.msra.mxu1 %v3112_v29 }
 0x14e   :  { %2268 = vmatprep.subr.bf16.mxu1 %v2785_v4 }
 0x21d   :  { %v657_v31 = vpop.f32.mrb[12].mxu0 }
 0x21e   :  { %v662_v34 = vmul.f32 0.001953125, %v657_v31  ;;  %v2222_v35 = vpop.f32.mrb[13].mxu0  ;;  %v2693_v31 = vld [vmem:[%s3429_s2 + $0x98] ss:$12 sps:$4 sm:$0xff]  }
 0x21f   :  { %v729_v36 = vpop.f32.mrb[12].mxu1  ;;  %v2694_v35 = vld [vmem:[%s3429_s2 + $0xa8] ss:$12 sps:$4 sm:$0xff]  }
 0x220   :  { %v734_v37 = vmul.f32 %v662_v34, %v662_v34  ;;  %v733_v38 = vmul.f32 0.001953125, %v729_v36  ;;  %v2257_v32 = vpop.f32.mrb[13].mxu1  ;;  %v2697_v36 = vld [vmem:[%s3429_s2 + $0xb0] ss:$12 sps:$4 sm:$0xff]  }
 0x222   :  { %v735_v41 = vsub.f32 %v733_v38, %v734_v37  ;;  %v888_v37 = vlaneseq }
 0x224   :  { %v736_v7 = vadd.f32 1e-05, %v735_v41  ;;  %v889_v38 = vshrl.u32 %v888_v37, 7 }
 0x226   :  { %2698 = vrsqrt.f32 %v736_v7  ;;  %v3209_v32 = vsub.s32 0, %v889_v38 }
 0x230   :  { %v2699_v46 = vpop.eup %2698 }
 0x231   :  { %v738_v16 = vmul.f32 %v2699_v46, %v561_v43 }
 0x233   :  { %2261 = vmatmul.mubr.msk.f32.vlgmr.msra.gmra.mrb[14].mxu0 %vm741_vm3, %v738_v16  ;;  %v739_v59 = vmul.f32 %v738_v16, %v662_v34  ;;  %v2696_v34 = vld [vmem:[%s3429_s2 + $0xac] ss:$12 sps:$4 sm:$0xff]  }
 0x234   :  { %1084 = vmatpush1.bf16.msra.mxu0 %v2666_v8  ;;  %1115 = vmatprep.mubr.bf16.mxu0 %v2782_v0 }
 0x235   :  { %v740_v1 = vsub.f32 %v562_v9, %v739_v59  ;;  %1085 = vmatprep.subr.bf16.mxu0 %v2672_v53 }
 0x237   :  { %2266 = vmatmul.mubr.msk.f32.vlgmr.msra.gmra.mrb[14].mxu1 %vm741_vm3, %v740_v1 }
 0x238   :  { %2269 = vmatpush3.bf16.msra.mxu1 %v2669_v61  ;;  %1086 = vmatpush1.bf16.msra.mxu0 %v2670_v62 }
 0x239   :  { %2270 = vmatprep.subr.bf16.mxu1 %v2785_v4  ;;  %1087 = vmatprep.subr.bf16.mxu0 %v2676_v5 }
 0x23a   :  { %2284 = vmatprep.mubr.msk.bf16.mxu1 %vm2784_vm0, %v2785_v4 }
 0x23c   :  { %2271 = vmatpush3.bf16.msra.mxu1 %v2673_v11  ;;  %1088 = vmatpush1.bf16.msra.mxu0 %v2674_v12 }
 0x23d   :  { %2272 = vmatprep.subr.bf16.mxu1 %v2785_v4  ;;  %1089 = vmatprep.subr.bf16.mxu0 %v2680_v13 }
 0x240   :  { %2273 = vmatpush3.bf16.msra.mxu1 %v2677_v15  ;;  %1090 = vmatpush1.bf16.msra.mxu0 %v2678_v17 }
 0x241   :  { %2274 = vmatprep.subr.bf16.mxu1 %v2785_v4  ;;  %1091 = vmatprep.subr.bf16.mxu0 %v2684_v18 }
 0x244   :  { %2275 = vmatpush3.bf16.msra.mxu1 %v2681_v19  ;;  %1092 = vmatpush1.bf16.msra.mxu0 %v2682_v20 }
 0x245   :  { %2276 = vmatprep.subr.bf16.mxu1 %v2785_v4  ;;  %1093 = vmatprep.subr.bf16.mxu0 %v2688_v26 }
 0x248   :  { %2277 = vmatpush3.bf16.msra.mxu1 %v2685_v22  ;;  %1094 = vmatpush1.bf16.msra.mxu0 %v2686_v24 }
 0x249   :  { %2278 = vmatprep.subr.bf16.mxu1 %v2785_v4  ;;  %1095 = vmatprep.subr.bf16.mxu0 %v2692_v30 }
 0x24c   :  { %2279 = vmatpush3.bf16.msra.mxu1 %v2689_v27  ;;  %1096 = vmatpush1.bf16.msra.mxu0 %v2690_v28 }
 0x24d   :  { %2280 = vmatprep.subr.bf16.mxu1 %v2785_v4  ;;  %1097 = vmatprep.subr.bf16.mxu0 %v2696_v34 }
 0x250   :  { %2281 = vmatpush3.bf16.msra.mxu1 %v2693_v31  ;;  %1098 = vmatpush1.bf16.msra.mxu0 %v2694_v35 }
 0x251   :  { %2282 = vmatprep.subr.bf16.mxu1 %v2785_v4  ;;  %2504 = vmatprep.subr.bf16.mxu0 %v2783_v45 }
 0x254   :  { %2283 = vmatpush3.bf16.msra.mxu1 %v2697_v36 }
 0x255   :  { %2528 = vmatprep.subr.bf16.mxu1 %v2783_v45 }
 0x306   :  { %v811_v41 = vpop.f32.mrb[14].mxu0 }
 0x307   :  { %v891_v7 = vrot.slane %v811_v41, %v3209_v32  ;;  %v2262_v43 = vpop.f32.mrb[15].mxu0 }
 0x309   :  { %v892_v8 = vmul.f32 %v891_v7, %v3043_v58  ;;  %v893_v9 = vmul.f32 %v891_v7, %v3046_v2  ;;  %v894_v59 = vmul.f32 %v891_v7, %v3049_v14  ;;  %v895_v61 = vmul.f32 %v891_v7, %v3076_v40 }
 0x30a   :  { %v884_v46 = vpop.f32.mrb[14].mxu1  ;;  %v896_v62 = vmul.f32 %v891_v7, %v3092_v55  ;;  %v897_v1 = vmul.f32 %v891_v7, %v3097_v10 }
 0x30b   :  { %v901_v16 = vrot.slane %v884_v46, %v3209_v32  ;;  %v2267_v53 = vpop.f32.mrb[15].mxu1 }
 0x30d   :  { %v902_v5 = vadd.f32 %v901_v16, %v892_v8  ;;  %v903_v11 = vadd.f32 %v901_v16, %v893_v9  ;;  %v904_v12 = vadd.f32 %v901_v16, %v894_v59  ;;  %v905_v13 = vadd.f32 %v901_v16, %v895_v61 }
 0x30e   :  { %v906_v15 = vadd.f32 %v901_v16, %v896_v62  ;;  %v907_v17 = vadd.f32 %v901_v16, %v897_v1 }
 0x30f   :  { %v908_v58 = vmax.f32 %v902_v5, 0.0  ;;  %v909_v18 = vmax.f32 %v903_v11, 0.0  ;;  %v910_v19 = vmax.f32 %v904_v12, 0.0  ;;  %v911_v20 = vmax.f32 %v905_v13, 0.0 }
 0x310   :  { %v912_v22 = vmax.f32 %v906_v15, 0.0  ;;  %v913_v2 = vmax.f32 %v907_v17, 0.0 }
 0x311   :  { %v914_v14 = vmul.f32 %v908_v58, %v3026_v23  ;;  %v915_v40 = vmul.f32 %v909_v18, %v3040_v52  ;;  %v916_v55 = vmul.f32 %v910_v19, %v3038_v50  ;;  %v917_v10 = vmul.f32 %v911_v20, %v3065_v33 }
 0x312   :  { %v918_v24 = vmul.f32 %v912_v22, %v3089_v49  ;;  %v919_v26 = vmul.f32 %v913_v2, %v3094_v56 }
 0x313   :  { %v920_v27 = vpack.c.bf16 %v915_v40, %v914_v14  ;;  %v921_v28 = vpack.c.bf16 %v917_v10, %v916_v55 }
 0x314   :  { %v922_v30 = vpack.c.bf16 %v919_v26, %v918_v24 }
 0x315   :  { %1116 = vmatmul.mubr.bf16.vlgmr.msra.gmra.mrb[16].mxu0 %v920_v27  ;;  %2285 = vmatmul.mubr.bf16.vlgmr.msra.gmra.mrb[16].mxu1 %v920_v27 }
 0x316   :  { %1125 = vmatprep.mubr.bf16.mxu0 %v2782_v0  ;;  %2288 = vmatprep.mubr.msk.bf16.mxu1 %vm2784_vm0, %v2785_v4 }
 0x317   :  { %2506 = vmatpush3.bf16.msra.mxu0 %v2910_v44  ;;  %2530 = vmatpush3.bf16.msra.mxu1 %v2910_v44 }
 0x318   :  { %2507 = vmatprep.subr.bf16.mxu0 %v2783_v45  ;;  %2531 = vmatprep.subr.bf16.mxu1 %v2783_v45 }
 0x31b   :  { %2509 = vmatpush3.bf16.msra.mxu0 %v2924_v48  ;;  %2533 = vmatpush3.bf16.msra.mxu1 %v2924_v48 }
 0x31c   :  { %2510 = vmatprep.subr.bf16.mxu0 %v2783_v45  ;;  %2534 = vmatprep.subr.bf16.mxu1 %v2783_v45 }
 0x31d   :  { %1126 = vmatmul.mubr.bf16.gmra.mrb[20].mxu0 %v921_v28  ;;  %2289 = vmatmul.mubr.bf16.gmra.mrb[20].mxu1 %v921_v28 }
 0x31e   :  { %1135 = vmatprep.mubr.bf16.mxu0 %v2782_v0  ;;  %2292 = vmatprep.mubr.msk.bf16.mxu1 %vm2784_vm0, %v2785_v4 }
 0x31f   :  { %2512 = vmatpush3.bf16.msra.mxu0 %v2936_v51  ;;  %2536 = vmatpush3.bf16.msra.mxu1 %v2936_v51 }
 0x320   :  { %2513 = vmatprep.subr.bf16.mxu0 %v2783_v45  ;;  %2537 = vmatprep.subr.bf16.mxu1 %v2783_v45 }
 0x323   :  { %2515 = vmatpush3.bf16.msra.mxu0 %v2948_v54  ;;  %2539 = vmatpush3.bf16.msra.mxu1 %v2948_v54 }
 0x324   :  { %2516 = vmatprep.subr.bf16.mxu0 %v2783_v45  ;;  %2540 = vmatprep.subr.bf16.mxu1 %v2783_v45 }
 0x325   :  { %1136 = vmatmul.mubr.bf16.gmra.mrb[24].mxu0 %v922_v30  ;;  %2293 = vmatmul.mubr.bf16.gmra.mrb[24].mxu1 %v922_v30 }
 0x326   :  { %2328 = vmatprep.mubr.msk.f32.mxu0 %vm2784_vm0, %v2785_v4  ;;  %2363 = vmatprep.mubr.msk.f32.mxu1 %vm2784_vm0, %v2785_v4 }
 0x327   :  { %2518 = vmatpush3.bf16.msra.mxu0 %v2960_v57  ;;  %2542 = vmatpush3.bf16.msra.mxu1 %v2960_v57 }
 0x328   :  { %2519 = vmatprep.subr.bf16.mxu0 %v2783_v45  ;;  %2543 = vmatprep.subr.bf16.mxu1 %v2783_v45 }
 0x32b   :  { %2521 = vmatpush3.bf16.msra.mxu0 %v2972_v60  ;;  %2545 = vmatpush3.bf16.msra.mxu1 %v2972_v60 }
 0x32c   :  { %2522 = vmatprep.subr.bf16.mxu0 %v2783_v45  ;;  %2546 = vmatprep.subr.bf16.mxu1 %v2783_v45 }
 0x32f   :  { %2524 = vmatpush3.bf16.msra.mxu0 %v2984_v63  ;;  %2548 = vmatpush3.bf16.msra.mxu1 %v2984_v63 }
 0x330   :  { %2525 = vmatprep.subr.bf16.mxu0 %v2783_v45  ;;  %2549 = vmatprep.subr.bf16.mxu1 %v2783_v45 }
 0x333   :  { %2527 = vmatpush3.bf16.msra.mxu0 %v2996_v3  ;;  %2551 = vmatpush3.bf16.msra.mxu1 %v2996_v3 }
 0x334   :  { %2366 = vmatprep.subr.mxu0 %v2785_v4  ;;  %2371 = vmatprep.subr.mxu1 %v2785_v4 }
 0x3e8   :  { %v1117_v0 = vpop.f32.mrb[16].mxu0  ;;  %v1180_v31 = vpop.f32.mrb[16].mxu1 }
 0x3e9   :  { %v1119_v34 = vpop.f32.mrb[17].mxu0  ;;  %v2286_v35 = vpop.f32.mrb[17].mxu1  ;;  %v1212_v38 = vrot.slane %v1117_v0, 7  ;;  %v1241_v41 = vrot.slane %v1180_v31, 1 }
 0x3ea   :  { %v1121_v36 = vpop.f32.mrb[18].mxu0  ;;  %v1183_v37 = vpop.f32.mrb[18].mxu1 }
 0x3eb   :  { %v1213_v7 = vrot.slane %v1121_v36, 7  ;;  %v1242_v43 = vrot.slane %v1183_v37, 1  ;;  %v1123_v46 = vpop.f32.mrb[19].mxu0  ;;  %v2287_v8 = vpop.f32.mrb[19].mxu1 }
 0x3ed   :  { %v1243_v16 = vsel %vm442_vm2, %v1241_v41, %v1242_v43  ;;  %v1214_v53 = vsel %vm1211_vm4, %v1212_v38, %v1213_v7 }
 0x3ee   :  { %v1230_v9 = vadd.f32 %v1214_v53, %v1123_v46 }
 0x3f0   :  { %v1127_v59 = vpop.f32.mrb[20].mxu0  ;;  %v1188_v61 = vpop.f32.mrb[20].mxu1 }
 0x3f1   :  { %v1215_v62 = vrot.slane %v1127_v59, 7  ;;  %v1244_v1 = vrot.slane %v1188_v61, 1  ;;  %v1129_v5 = vpop.f32.mrb[21].mxu0  ;;  %v2290_v11 = vpop.f32.mrb[21].mxu1 }
 0x3f2   :  { %v1131_v12 = vpop.f32.mrb[22].mxu0  ;;  %v1191_v13 = vpop.f32.mrb[22].mxu1 }
 0x3f3   :  { %v1245_v15 = vsel %vm442_vm2, %v1242_v43, %v1244_v1  ;;  %v1216_v17 = vsel %vm1211_vm4, %v1213_v7, %v1215_v62  ;;  %v1217_v58 = vrot.slane %v1131_v12, 7  ;;  %v1246_v18 = vrot.slane %v1191_v13, 1  ;;  %v1133_v19 = vpop.f32.mrb[23].mxu0  ;;  %v2291_v20 = vpop.f32.mrb[23].mxu1 }
 0x3f4   :  { %v1261_v22 = vadd.f32 %v1245_v15, %v1230_v9  ;;  %v1231_v2 = vadd.f32 %v1216_v17, %v1129_v5 }
 0x3f5   :  { %v1247_v14 = vsel %vm442_vm2, %v1244_v1, %v1246_v18  ;;  %v1218_v40 = vsel %vm1211_vm4, %v1215_v62, %v1217_v58 }
 0x3f6   :  { %v1262_v55 = vadd.f32 %v1247_v14, %v1231_v2  ;;  %v1232_v10 = vadd.f32 %v1218_v40, %v1133_v19  ;;  %v3280_v13 = vmul.f32 %v1261_v22, %v3040_v52 }
 0x3f8   :  { %v1137_v24 = vpop.f32.mrb[24].mxu0  ;;  %v1196_v26 = vpop.f32.mrb[24].mxu1 }
 0x3f9   :  { %v1219_v27 = vrot.slane %v1137_v24, 7  ;;  %v1248_v28 = vrot.slane %v1196_v26, 1  ;;  %v1139_v30 = vpop.f32.mrb[25].mxu0  ;;  %v2294_v0 = vpop.f32.mrb[25].mxu1 }
 0x3fa   :  { %v1141_v31 = vpop.f32.mrb[26].mxu0  ;;  %v1199_v35 = vpop.f32.mrb[26].mxu1 }
 0x3fb   :  { %v1249_v36 = vsel %vm442_vm2, %v1246_v18, %v1248_v28  ;;  %v1220_v37 = vsel %vm1211_vm4, %v1217_v58, %v1219_v27  ;;  %v1204_v7 = vrot.slane %v1141_v31, 7  ;;  %v1250_v43 = vrot.slane %v1199_v35, 1  ;;  %v1143_v46 = vpop.f32.mrb[27].mxu0  ;;  %v2295_v8 = vpop.f32.mrb[27].mxu1 }
 0x3fc   :  { %v1263_v53 = vadd.f32 %v1249_v36, %v1232_v10  ;;  %v1233_v9 = vadd.f32 %v1220_v37, %v1139_v30  ;;  %v3283_v58 = vmul.f32 %v1262_v55, %v3038_v50 }
 0x3fd   :  { %v1228_v59 = vsel %vm1211_vm4, %v1204_v7, %v1212_v38  ;;  %v1251_v61 = vsel %vm442_vm2, %v1248_v28, %v1250_v43  ;;  %v1221_v62 = vsel %vm1211_vm4, %v1219_v27, %v1204_v7  ;;  %v1259_v1 = vsel %vm442_vm2, %v1250_v43, %v1241_v41 }
 0x3fe   :  { %v1229_v5 = vadd.f32 %v1228_v59, %v1119_v34  ;;  %v1264_v11 = vadd.f32 %v1251_v61, %v1233_v9  ;;  %v1234_v12 = vadd.f32 %v1221_v62, %v1143_v46  ;;  %v1286_v38 = vmul.f32 %v3280_v13, %v3280_v13 }
 0x3ff   :  { %v3291_v19 = vmul.f32 %v1263_v53, %v3065_v33  ;;  %v1287_v41 = vmul.f32 %v3283_v58, %v3283_v58 }
 0x400   :  { %v1260_v15 = vadd.f32 %v1243_v16, %v1229_v5  ;;  %v1265_v17 = vadd.f32 %v1259_v1, %v1234_v12  ;;  %v3300_v16 = vmul.f32 %v1264_v11, %v3089_v49  ;;  %v1619_v12 = vadd.f32 %v3031_v39, %v3024_v21 }
 0x401   :  { %v1288_v20 = vmul.f32 %v3291_v19, %v3291_v19 }
 0x402   :  { %v3286_v18 = vmul.f32 %v1260_v15, %v3026_v23  ;;  %v3306_v33 = vmul.f32 %v1265_v17, %v3094_v56  ;;  %v1289_v14 = vmul.f32 %v3300_v16, %v3300_v16  ;;  %v1631_v15 = vmul.f32 %v3031_v39, %v3031_v39 }
 0x403   :  { %v1630_v17 = vmul.f32 %v3024_v21, %v3024_v21 }
 0x404   :  { %v1274_v34 = vadd.f32 %v3280_v13, %v3286_v18  ;;  %v1285_v52 = vmul.f32 %v3286_v18, %v3286_v18  ;;  %v1290_v10 = vmul.f32 %v3306_v33, %v3306_v33 }
 0x406   :  { %v1291_v50 = vadd.f32 %v1286_v38, %v1285_v52  ;;  %v1275_v23 = vadd.f32 %v1274_v34, %v3283_v58  ;;  %v1272_v38 = vld [vmem:[%s3435_s8] sm:$0x1]  ;;  %v1636_v34 = vadd.f32 %v1631_v15, %v1630_v17  ;;  %v1620_v52 = vadd.f32 %v1619_v12, %v3036_v47 }
 0x408   :  { %v1276_v22 = vadd.f32 %v1275_v23, %v3291_v19  ;;  %v1292_v2 = vadd.f32 %v1291_v50, %v1287_v41  ;;  %v1632_v41 = vmul.f32 %v3036_v47, %v3036_v47  ;;  %v1621_v23 = vadd.f32 %v1620_v52, %v3058_v25 }
 0x40a   :  { %v1277_v40 = vadd.f32 %v1276_v22, %v3300_v16  ;;  %v1293_v55 = vadd.f32 %v1292_v2, %v1288_v20  ;;  %v1633_v20 = vmul.f32 %v3058_v25, %v3058_v25  ;;  %v1273_v2 = vld [vmem:[%s3436_s9] sm:$0x1] }
 0x40c   :  { %v1278_v49 = vadd.f32 %v1277_v40, %v3306_v33  ;;  %v1294_v24 = vadd.f32 %v1293_v55, %v1289_v14  ;;  %v1637_v14 = vadd.f32 %v1636_v34, %v1632_v41 }
 0x40e   :  { %v1279_v26 = vrot.slane %v1278_v49, 4  ;;  %v1295_v27 = vadd.f32 %v1294_v24, %v1290_v10  ;;  %v1638_v55 = vadd.f32 %v1637_v14, %v1633_v20  ;;  %v1634_v10 = vmul.f32 %v3079_v42, %v3079_v42 }
 0x410   :  { %v1280_v28 = vadd.f32 %v1279_v26, %v1278_v49  ;;  %v1296_v56 = vrot.slane %v1295_v27, 4  ;;  %v1622_v49 = vadd.f32 %v1621_v23, %v3079_v42 }
 0x412   :  { %v1281_v30 = vrot.slane %v1280_v28, 2  ;;  %v1297_v0 = vadd.f32 %v1296_v56, %v1295_v27  ;;  %v1623_v26 = vadd.f32 %v1622_v49, %v3084_v6  ;;  %v1639_v27 = vadd.f32 %v1638_v55, %v1634_v10 }
 0x414   :  { %v1282_v31 = vadd.f32 %v1281_v30, %v1280_v28  ;;  %v1298_v35 = vrot.slane %v1297_v0, 2  ;;  %v1635_v28 = vmul.f32 %v3084_v6, %v3084_v6  ;;  %v1624_v56 = vrot.slane %v1623_v26, 4 }
 0x416   :  { %v1283_v36 = vrot.slane %v1282_v31, 1  ;;  %v1299_v37 = vadd.f32 %v1298_v35, %v1297_v0  ;;  %v1640_v30 = vadd.f32 %v1639_v27, %v1635_v28 }
 0x418   :  { %v1284_v7 = vadd.f32 %v1283_v36, %v1282_v31  ;;  %v1300_v43 = vrot.slane %v1299_v37, 1  ;;  %v1641_v0 = vrot.slane %v1640_v30, 4 }
 0x41a   :  { %2329 = vmatmul.mubr.f32.vlgmr.msra.gmra.mrb[28].mxu0 %v1284_v7  ;;  %v1301_v46 = vadd.f32 %v1300_v43, %v1299_v37  ;;  %v1642_v31 = vadd.f32 %v1641_v0, %v1640_v30 }
 0x41b   :  { %2367 = vmatpush3.msra.mxu0 %v3112_v29  ;;  %2368 = vmatprep.mubr.msk.f32.mxu0 %vm2784_vm0, %v2785_v4 }
 0x41c   :  { %2364 = vmatmul.mubr.f32.vlgmr.msra.gmra.mrb[28].mxu1 %v1301_v46  ;;  %2552 = vmatprep.subr.bf16.mxu0 %v2783_v45  ;;  %v1643_v35 = vrot.slane %v1642_v31, 2 }
 0x41d   :  { %2372 = vmatpush3.msra.mxu1 %v3112_v29  ;;  %2373 = vmatprep.mubr.msk.f32.mxu1 %vm2784_vm0, %v2785_v4 }
 0x41e   :  { %2576 = vmatprep.subr.bf16.mxu1 %v2783_v45  ;;  %v1644_v36 = vadd.f32 %v1643_v35, %v1642_v31 }
 0x420   :  { %v1645_v37 = vrot.slane %v1644_v36, 1 }
 0x4ed   :  { %v1368_v8 = vpop.f32.mrb[28].mxu0 }
 0x4ee   :  { %v1372_v53 = vmul.f32 0.001953125, %v1368_v8  ;;  %v2330_v9 = vpop.f32.mrb[29].mxu0 }
 0x4ef   :  { %v1439_v59 = vpop.f32.mrb[28].mxu1 }
 0x4f0   :  { %v1444_v61 = vmul.f32 %v1372_v53, %v1372_v53  ;;  %v1443_v62 = vmul.f32 0.001953125, %v1439_v59  ;;  %v2365_v1 = vpop.f32.mrb[29].mxu1 }
 0x4f2   :  { %v1445_v5 = vsub.f32 %v1443_v62, %v1444_v61 }
 0x4f4   :  { %v1446_v11 = vadd.f32 1e-05, %v1445_v5 }
 0x4f6   :  { %2700 = vrsqrt.f32 %v1446_v11 }
 0x500   :  { %v2701_v50 = vpop.eup %2700 }
 0x501   :  { %v1448_v22 = vmul.f32 %v2701_v50, %v1272_v38  ;;  %v1618_v50 = vld [vmem:[%s3438_s11] sm:$0x1] }
 0x503   :  { %2369 = vmatmul.mubr.msk.f32.vlgmr.msra.gmra.mrb[30].mxu0 %vm741_vm3, %v1448_v22  ;;  %v1449_v40 = vmul.f32 %v1448_v22, %v1372_v53 }
 0x504   :  { %2554 = vmatpush3.bf16.msra.mxu0 %v2910_v44  ;;  %2408 = vmatprep.mubr.msk.f32.mxu0 %vm2784_vm0, %v2785_v4 }
 0x505   :  { %2555 = vmatprep.subr.bf16.mxu0 %v2783_v45  ;;  %v1450_v24 = vsub.f32 %v1273_v2, %v1449_v40 }
 0x507   :  { %2374 = vmatmul.mubr.msk.f32.vlgmr.msra.gmra.mrb[30].mxu1 %vm741_vm3, %v1450_v24 }
 0x508   :  { %2557 = vmatpush3.bf16.msra.mxu0 %v2924_v48  ;;  %2578 = vmatpush3.bf16.msra.mxu1 %v2910_v44  ;;  %v1625_v44 = vadd.f32 %v1624_v56, %v1623_v26 }
 0x509   :  { %2558 = vmatprep.subr.bf16.mxu0 %v2783_v45  ;;  %2579 = vmatprep.subr.bf16.mxu1 %v2783_v45 }
 0x50a   :  { %2443 = vmatprep.mubr.msk.f32.mxu1 %vm2784_vm0, %v2785_v4 }
 0x50c   :  { %2560 = vmatpush3.bf16.msra.mxu0 %v2936_v51  ;;  %2581 = vmatpush3.bf16.msra.mxu1 %v2924_v48  ;;  %v1626_v48 = vrot.slane %v1625_v44, 2 }
 0x50d   :  { %2561 = vmatprep.subr.bf16.mxu0 %v2783_v45  ;;  %2582 = vmatprep.subr.bf16.mxu1 %v2783_v45 }
 0x510   :  { %2563 = vmatpush3.bf16.msra.mxu0 %v2948_v54  ;;  %2584 = vmatpush3.bf16.msra.mxu1 %v2936_v51  ;;  %v1627_v51 = vadd.f32 %v1626_v48, %v1625_v44 }
 0x511   :  { %2564 = vmatprep.subr.bf16.mxu0 %v2783_v45  ;;  %2585 = vmatprep.subr.bf16.mxu1 %v2783_v45 }
 0x514   :  { %2566 = vmatpush3.bf16.msra.mxu0 %v2960_v57  ;;  %2587 = vmatpush3.bf16.msra.mxu1 %v2948_v54  ;;  %v1628_v54 = vrot.slane %v1627_v51, 1 }
 0x515   :  { %2567 = vmatprep.subr.bf16.mxu0 %v2783_v45  ;;  %2588 = vmatprep.subr.bf16.mxu1 %v2783_v45 }
 0x518   :  { %2569 = vmatpush3.bf16.msra.mxu0 %v2972_v60  ;;  %2590 = vmatpush3.bf16.msra.mxu1 %v2960_v57  ;;  %v1629_v57 = vadd.f32 %v1628_v54, %v1627_v51 }
 0x519   :  { %2570 = vmatprep.subr.bf16.mxu0 %v2783_v45  ;;  %2591 = vmatprep.subr.bf16.mxu1 %v2783_v45 }
 0x51c   :  { %2572 = vmatpush3.bf16.msra.mxu0 %v2984_v63  ;;  %2593 = vmatpush3.bf16.msra.mxu1 %v2972_v60  ;;  %v1646_v60 = vadd.f32 %v1645_v37, %v1644_v36 }
 0x51d   :  { %2573 = vmatprep.subr.bf16.mxu0 %v2783_v45  ;;  %2594 = vmatprep.subr.bf16.mxu1 %v2783_v45 }
 0x520   :  { %2575 = vmatpush3.bf16.msra.mxu0 %v2996_v3  ;;  %2596 = vmatpush3.bf16.msra.mxu1 %v2984_v63 }
 0x521   :  { %2597 = vmatprep.subr.bf16.mxu1 %v2783_v45  ;;  %2446 = vmatprep.subr.mxu0 %v2785_v4 }
 0x523   :  { %2409 = vmatmul.mubr.f32.vlgmr.msra.gmra.mrb[32].mxu0 %v1629_v57 }
 0x524   :  { %2599 = vmatpush3.bf16.msra.mxu1 %v2996_v3  ;;  %2447 = vmatpush3.msra.mxu0 %v3112_v29 }
 0x525   :  { %2448 = vmatprep.mubr.msk.f32.mxu0 %vm2784_vm0, %v2785_v4  ;;  %2451 = vmatprep.subr.mxu1 %v2785_v4 }
 0x527   :  { %2444 = vmatmul.mubr.f32.vlgmr.msra.gmra.mrb[32].mxu1 %v1646_v60 }
 0x528   :  { %2452 = vmatpush3.msra.mxu1 %v3112_v29  ;;  %2453 = vmatprep.mubr.msk.f32.mxu1 %vm2784_vm0, %v2785_v4 }
 0x5d6   :  { %v1520_v45 = vpop.f32.mrb[30].mxu0 }
 0x5d7   :  { %v1600_v63 = vrot.slane %v1520_v45, %v3209_v32  ;;  %v2370_v7 = vpop.f32.mrb[31].mxu0 }
 0x5d9   :  { %v1601_v3 = vmul.f32 %v1600_v63, %v3286_v18  ;;  %v1602_v46 = vmul.f32 %v1600_v63, %v3280_v13  ;;  %v1603_v8 = vmul.f32 %v1600_v63, %v3283_v58  ;;  %v1604_v53 = vmul.f32 %v1600_v63, %v3291_v19 }
 0x5da   :  { %v1593_v43 = vpop.f32.mrb[30].mxu1  ;;  %v1605_v29 = vmul.f32 %v1600_v63, %v3300_v16  ;;  %v1606_v4 = vmul.f32 %v1600_v63, %v3306_v33  ;;  %v1617_v16 = vld [vmem:[%s3437_s10] sm:$0x1]  ;;  %s2786_s10 = smov [#allocation7]  }
 0x5db   :  { %v1610_v9 = vrot.slane %v1593_v43, %v3209_v32  ;;  %v2375_v59 = vpop.f32.mrb[31].mxu1  ;;  %s1985_s11 = sshll.u32 %s2786_s10, 4  ;;  %s1986_s11 = int_to_ptr.vmem [resolvable:$true] %s1985_s11 }
 0x5dc   :  { %s2748_s20 = scalar_lea.vmem %s1986_s11, 768  ;;  %p2753_p3 = scmp.lt.s32.totalorder %s1986_s11, %s1986_s11 }
 0x5dd   :  { %v1611_v61 = vadd.f32 %v1610_v9, %v1601_v3  ;;  %v1612_v62 = vadd.f32 %v1610_v9, %v1602_v46  ;;  %v1613_v1 = vadd.f32 %v1610_v9, %v1603_v8  ;;  %v1614_v5 = vadd.f32 %v1610_v9, %v1604_v53  ;;  %p2749_p2 = scmp.ne.s32.totalorder %s1986_s11, %s2748_s20  ;;  %p2754_p4 = scmp.lt.s32.totalorder %s2748_s20, %s2748_s20 }
 0x5de   :  { %v1615_v11 = vadd.f32 %v1610_v9, %v1605_v29  ;;  %v1616_v18 = vadd.f32 %v1610_v9, %v1606_v4 }
 0x5df   :  { %p2755_p5 = por %p2754_p4, %p2753_p3 }
 0x5e1   :  { %p2756_p6 = pnand %p2755_p5, %p2749_p2 }
 0x5f6   :  { %v1713_v12 = vpop.f32.mrb[32].mxu0 }
 0x5f7   :  { %v1717_v15 = vmul.f32 0.001953125, %v1713_v12  ;;  %v2410_v13 = vpop.f32.mrb[33].mxu0 }
 0x5f9   :  { %v1789_v58 = vmul.f32 %v1717_v15, %v1717_v15 }
 0x5fa   :  { %v1784_v17 = vpop.f32.mrb[32].mxu1 }
 0x5fb   :  { %v1788_v38 = vmul.f32 0.001953125, %v1784_v17  ;;  %v2445_v19 = vpop.f32.mrb[33].mxu1 }
 0x5fd   :  { %v1790_v34 = vsub.f32 %v1788_v38, %v1789_v58 }
 0x5ff   :  { %v1791_v52 = vadd.f32 1e-05, %v1790_v34 }
 0x601   :  { %2702 = vrsqrt.f32 %v1791_v52 }
 0x60b   :  { %v2703_v33 = vpop.eup %2702 }
 0x60c   :  { %v1793_v41 = vmul.f32 %v2703_v33, %v1617_v16 }
 0x60e   :  { %2449 = vmatmul.mubr.msk.f32.vlgmr.msra.gmra.mrb[34].mxu0 %vm741_vm3, %v1793_v41  ;;  %v1794_v23 = vmul.f32 %v1793_v41, %v1717_v15 }
 0x610   :  { %v1795_v20 = vsub.f32 %v1618_v50, %v1794_v23 }
 0x612   :  { %2454 = vmatmul.mubr.msk.f32.vlgmr.msra.gmra.mrb[34].mxu1 %vm741_vm3, %v1795_v20 }
 0x6e1   :  { %v1865_v22 = vpop.f32.mrb[34].mxu0 }
 0x6e2   :  { %v1945_v2 = vrot.slane %v1865_v22, %v3209_v32  ;;  %v2450_v14 = vpop.f32.mrb[35].mxu0 }
 0x6e4   :  { %v1946_v40 = vmul.f32 %v1945_v2, %v3024_v21  ;;  %v1947_v49 = vmul.f32 %v1945_v2, %v3031_v39  ;;  %v1948_v10 = vmul.f32 %v1945_v2, %v3036_v47  ;;  %v1949_v24 = vmul.f32 %v1945_v2, %v3058_v25 }
 0x6e5   :  { %v1938_v55 = vpop.f32.mrb[34].mxu1  ;;  %v1950_v28 = vmul.f32 %v1945_v2, %v3079_v42  ;;  %v1951_v56 = vmul.f32 %v1945_v2, %v3084_v6 }
 0x6e6   :  { %v1955_v26 = vrot.slane %v1938_v55, %v3209_v32  ;;  %v2455_v27 = vpop.f32.mrb[35].mxu1 }
 0x6e8   :  { %v1956_v30 = vadd.f32 %v1955_v26, %v1946_v40  ;;  %v1957_v44 = vadd.f32 %v1955_v26, %v1947_v49  ;;  %v1958_v0 = vadd.f32 %v1955_v26, %v1948_v10  ;;  %v1959_v48 = vadd.f32 %v1955_v26, %v1949_v24 }
 0x6e9   :  { %v1960_v31 = vadd.f32 %v1955_v26, %v1950_v28  ;;  %v1961_v21 = vadd.f32 %v1955_v26, %v1951_v56 }
 0x6ea   :  { %v1962_v39 = vadd.f32 %v1956_v30, %v1611_v61  ;;  %v1963_v51 = vadd.f32 %v1957_v44, %v1612_v62  ;;  %v1964_v47 = vadd.f32 %v1958_v0, %v1613_v1  ;;  %v1965_v35 = vadd.f32 %v1959_v48, %v1614_v5 }
 0x6eb   :  { %v1966_v25 = vadd.f32 %v1960_v31, %v1615_v11  ;;  %v1967_v54 = vadd.f32 %v1961_v21, %v1616_v18 }
 0x6ec   :  { %v1968_v32 = vmax.f32 %v1962_v39, 0.0  ;;  %v1969_v36 = vmax.f32 %v1963_v51, 0.0  ;;  %v1970_v57 = vmax.f32 %v1964_v47, 0.0  ;;  %v1971_v42 = vmax.f32 %v1965_v35, 0.0 }
 0x6ed   :  { %v1972_v6 = vmax.f32 %v1966_v25, 0.0  ;;  %v1973_v37 = vmax.f32 %v1967_v54, 0.0 }
 0x6ee   :  { %1974 = vst [vmem:[#allocation7] sm:$0xff] %v1968_v32  ;;  %1975 = vst [vmem:[#allocation7 + $0x8] sm:$0xff] %v1969_v36 }
 0x6ef   :  { %1976 = vst [vmem:[#allocation7 + $0x10] sm:$0xff] %v1970_v57  ;;  %1977 = vst [vmem:[#allocation7 + $0x18] sm:$0xff] %v1971_v42 }
 0x6f0   :  { %1978 = vst [vmem:[#allocation7 + $0x20] sm:$0xff] %v1972_v6  ;;  %1979 = vst [vmem:[#allocation7 + $0x28] sm:$0xff] %v1973_v37 }
 0x6f1   :  { %2759 = shalt.err (!%p2756_p6)
}
 0x6f2   :  { %s2760_s6 = scalar_lea.hbm %s3439_s12, 768 }
 0x6f3   :  { %p2761_p7 = scmp.ne.s32.totalorder %s3439_s12, %s2760_s6  ;;  %p2764_p8 = scmp.lt.u32.totalorder %s2760_s6, %s3439_s12 }
 0x6f5   :  { %p2766_p9 = pnand %p2764_p8, %p2761_p7 }
 0x6f7   :  { %2769 = shalt.err (!%p2766_p9)
}
 0x6f8   :  { %s2787_s27 = smov 128   ;;  %s2788_s7 = smov 8  }
 0x6f9   :  { %1991 = dma.vmem_to_hbm [thread:$0]  %s1986_s11, 768, %s3439_s12, [#allocation4], %s2787_s27, %s2787_s27, %s2788_s7  }
 0x6fa   :  { %2774 = dma.done.wait [#allocation4], 768  }
 0x6fb   :  { %2775 = vsyncadd [#allocation4], 4294966528 }
 0x6fc   :  { %1995 = vsyncpa [#allocation3], 1 }
 0x6fd   :  { %1996 = vsyncpa [#allocation6], 1 }
 0x6fe   :  { %1997 = vsyncpa [#allocation4], 1 }

</bundles_post_ra>
